<compile_context>
chip_gen: v7x
topology: tpu7x:2x2x1
jax: 0.10.0
libtpu: 0.0.40
codegen_flags: <defaults>
</compile_context>

<pallas_src>
import functools

import jax
import jax.numpy as jnp
from jax.experimental import pallas as pl
from jax.experimental.pallas import tpu as pltpu
import numpy as np


# ---------------------------------------------------------------------------
# Kernel
# ---------------------------------------------------------------------------
def _upsample2x_kernel(x_ref, o_ref):
    # x_ref: (bp, bh, W)   block of input rows, native dtype (no casts)
    # o_ref: (bp, bh, 4W)  free view of the corresponding (bp, 2*bh, 2W) output
    #                      block: o[p, i, :] = [out_row_{2i} | out_row_{2i+1}]
    x = x_ref[...]
    bp, bh, w = x.shape
    # Column interleave: row[..., 2j + b] = x[..., j]   (static broadcast+reshape)
    row = jnp.broadcast_to(x[:, :, :, None], (bp, bh, w, 2)).reshape(bp, bh, 2 * w)
    if (2 * w) % 128 == 0:
        # Both halves start on a 128-lane boundary -> two unmasked full-width stores.
        o_ref[:, :, : 2 * w] = row          # output row 2i
        o_ref[:, :, 2 * w:] = row           # output row 2i + 1
    else:
        # Unaligned second half would lower to shifted/masked partial stores:
        # build the full 4W row pair once and issue a single full-block store.
        o_ref[...] = jnp.concatenate([row, row], axis=-1)


# ---------------------------------------------------------------------------
# Block sizing (padded-bytes aware, per-generation VMEM budget)
# ---------------------------------------------------------------------------
def _round_up(x, m):
    return -(-x // m) * m


def _divisors(n):
    return [d for d in range(1, n + 1) if n % d == 0]


def _padded_block_bytes(bp, bh, w, itemsize, sub):
    """Padded VMEM bytes of one (input + output) block buffer."""
    rows = _round_up(bh, sub)
    in_b = bp * rows * _round_up(w, 128) * itemsize
    out_b = bp * rows * _round_up(4 * w, 128) * itemsize
    return in_b + out_b


def _vmem_budget():
    """Returns (vmem_limit_bytes, usable budget for the double-buffered blocks)."""
    try:
        cap = int(pltpu.get_tpu_info().vmem_capacity_bytes)
    except Exception:
        cap = 64 * 1024 * 1024              # conservative (v7x-sized) fallback
    if cap >= 100 * 1024 * 1024:            # v5e / v6e: 128 MiB physical VMEM
        limit = 64 * 1024 * 1024
    else:                                   # v7x: 64 MiB physical VMEM
        limit = 48 * 1024 * 1024
    return limit, (limit * 3) // 4          # leave headroom for metadata/scratch


def _pick_block(P, H, W, dtype):
    """Choose (bp, bh, vmem_limit): planes / input-rows per grid step."""
    itemsize = np.dtype(dtype).itemsize
    sub = max(8, 32 // itemsize)            # sublane tile: 8 f32 / 16 bf16 / 32 int8
    vmem_limit, budget = _vmem_budget()

    # Legal row-block sizes: multiples of the dtype sublane tile that divide H,
    # or the full H (full array dim is always legal).
    bh_cands = sorted({d for d in _divisors(H) if d % sub == 0} | {H})
    bp_cands = _divisors(P)

    best, best_key = None, None
    for bp in bp_cands:
        for bh in bh_cands:
            block_bytes = _padded_block_bytes(bp, bh, W, itemsize, sub)
            if 2 * block_bytes > budget:    # double-buffered by the pipeline
                continue
            steps = (P // bp) * (H // bh)
            # Priority: >= 2 grid steps (megacore sharding + DMA overlap),
            # then the biggest padded block (amortize ~0.35us/step overhead),
            # then a split along the leading plane axis.
            key = (steps >= 2, block_bytes, (P // bp) >= 2)
            if best_key is None or key > best_key:
                best_key, best = key, (bp, bh)

    if best is None:
        # Even the smallest legal block overflows the default budget (huge W):
        # take it anyway and request a larger VMEM limit.
        bp, bh = 1, bh_cands[0]
        need = 2 * _padded_block_bytes(bp, bh, W, itemsize, sub) + (4 << 20)
        vmem_limit = max(vmem_limit, need)
        best = (bp, bh)
    return best[0], best[1], int(vmem_limit)


# ---------------------------------------------------------------------------
# Wrapper (pallas_call built once per shape/dtype, cached)
# ---------------------------------------------------------------------------
@functools.lru_cache(maxsize=None)
def _build_upsample_call(P, H, W, dtype_name):
    dtype = np.dtype(dtype_name)
    bp, bh, vmem_limit = _pick_block(P, H, W, dtype)
    grid = (P // bp, H // bh)
    return pl.pallas_call(
        _upsample2x_kernel,
        out_shape=jax.ShapeDtypeStruct((P, H, 4 * W), dtype),
        grid=grid,
        in_specs=[pl.BlockSpec((bp, bh, W), lambda pi, hi: (pi, hi, 0))],
        out_specs=pl.BlockSpec((bp, bh, 4 * W), lambda pi, hi: (pi, hi, 0)),
        compiler_params=pltpu.CompilerParams(
            dimension_semantics=("parallel", "parallel"),
            vmem_limit_bytes=vmem_limit,
        ),
    )


def upsample_nearest_2x(x):
    """x: (N, C, H, W) -> (N, C, 2H, 2W), nearest-neighbor, scale_factor=2."""
    N, C, H, W = x.shape
    P = N * C
    call = _build_upsample_call(int(P), int(H), int(W), x.dtype.name)
    out = call(x.reshape(P, H, W))             # free reshape
    return out.reshape(N, C, 2 * H, 2 * W)     # free reshape


if __name__ == "__main__":
    key = jax.random.PRNGKey(0)
    x = jax.random.normal(key, (2, 4, 16, 16), dtype=jnp.float32)

    y = jax.block_until_ready(upsample_nearest_2x(x))

    # Reference: nearest-neighbor 2x upsample (matches F.interpolate(..., 'nearest')).
    ref = jnp.repeat(jnp.repeat(x, 2, axis=2), 2, axis=3)

    assert y.shape == (2, 4, 32, 32), y.shape
    np.testing.assert_array_equal(np.asarray(y), np.asarray(ref))

    print("KERNEL_OK")
</pallas_src>

<mosaic_0001>
module attributes {stable_mosaic.version = 11 : i64} {
  func.func @_upsample2x_kernel(%arg0: i32, %arg1: i32, %arg2: memref<4x16x16xf32, #tpu.memory_space<vmem>>, %arg3: memref<4x16x64xf32, #tpu.memory_space<vmem>>) attributes {dimension_semantics = [#tpu.dimension_semantics<parallel>, #tpu.dimension_semantics<parallel>], iteration_bounds = array<i64: 2, 1>, scalar_prefetch = 0 : i64, scratch_operands = 0 : i64, tpu.core_type = #tpu.core_type<tc>, window_params = [{transform_indices = @transform_0, window_bounds = array<i64: 4, 16, 16>}, {transform_indices = @transform_1, window_bounds = array<i64: 4, 16, 64>}]} {
    %c0 = arith.constant 0 : index
    %c0_0 = arith.constant 0 : index
    %c0_1 = arith.constant 0 : index
    %0 = vector.load %arg2[%c0, %c0_0, %c0_1] : memref<4x16x16xf32, #tpu.memory_space<vmem>>, vector<4x16x16xf32>
    %1 = vector.shape_cast %0 : vector<4x16x16xf32> to vector<4x16x16x1xf32>
    %2 = vector.shape_cast %1 : vector<4x16x16x1xf32> to vector<4x16x16x1xf32>
    %3 = vector.broadcast %2 : vector<4x16x16x1xf32> to vector<4x16x16x2xf32>
    %4 = vector.shape_cast %3 : vector<4x16x16x2xf32> to vector<4x16x32xf32>
    %5 = tpu.concatenate %4, %4 in 2 : vector<4x16x32xf32>, vector<4x16x32xf32> -> vector<4x16x64xf32>
    %c0_2 = arith.constant 0 : index
    %c0_3 = arith.constant 0 : index
    %c0_4 = arith.constant 0 : index
    %6 = vector.load %arg3[%c0_2, %c0_3, %c0_4] : memref<4x16x64xf32, #tpu.memory_space<vmem>>, vector<4x16x64xf32>
    tpu.vector_store %arg3[%c0_2, %c0_3, %c0_4], %5 {strides = array<i32>} : memref<4x16x64xf32, #tpu.memory_space<vmem>>, vector<4x16x64xf32>,
    return
  }
  func.func @transform_0(%arg0: i32, %arg1: i32) -> (i32, i32, i32) {
    %c0_i32 = arith.constant 0 : i32
    %c0_i32_0 = arith.constant 0 : i32
    return %arg0, %arg1, %c0_i32 : i32, i32, i32
  }
  func.func @transform_1(%arg0: i32, %arg1: i32) -> (i32, i32, i32) {
    %c0_i32 = arith.constant 0 : i32
    %c0_i32_0 = arith.constant 0 : i32
    return %arg0, %arg1, %c0_i32 : i32, i32, i32
  }
}

</mosaic_0001>

<bundles_post_ra>
// kernel: tpu_custom_call.1
= control target key start
LH: loop header
LB: loop body
LE: loop exit
PB: predicated region body
PF: predicated region fallthrough
CT: control target
= control target key end

     0   :  { %6 = vsyncpa [#allocation3], 0  ;;  %s6400_s0 = inlined_call_operand.hbm [shape: f32[8,16,16], index: 0, kind: input, shape index: {}]   ;;  %s6401_s1 = inlined_call_operand.hbm [shape: f32[8,16,64], index: 1, kind: output, shape index: {}]  }
   0x1   :  { %8 = vsyncpa [#allocation3 + $0x1], 0 }
   0x2   :  { %9 = vsyncpa [#allocation4], 0 }
   0x3   :  { %11 = vsyncpa [#allocation4 + $0x1], 0  ;;  %s4066_s6 = smov 0   ;;  %s4068_s7 = smov 0  }
   0x4   :  { %s4070_s8 = smov 0   ;;  %s4072_s9 = smov 0  }
   0x5   :  { %s4074_s10 = smov 0   ;;  %s4076_s11 = smov 0  }
   0x6 LB: > { %s3815_s12 = sadd.s32 4294967295, %s4031_s11   ;;  %s3816_s13 = sadd.s32 4294967294, %s4031_s11   ;;  %s4031_s11 = sphi %s4076_s11, %s17_s11   ;;  %s4027_s10 = sphi %s4074_s10, %s6806_s10   ;;  %s4023_s9 = sphi %s4072_s9, %s6805_s9   ;;  %s4019_s8 = sphi %s4070_s8, %s6804_s8   ;;  %s4015_s7 = sphi %s4068_s7, %s6803_s7   ;;  %s4011_s6 = sphi %s4066_s6, %s6802_s6  }
   0x7   : > { %s29_s14 = sadd.s32 1, %s4027_s10  ;;  %s38_s15 = sadd.s32 1, %s4019_s8 }
   0x8   : > { %p31_p0 = scmp.ge.s32.totalorder %s29_s14, 2  ;;  %p45_p1 = scmp.ne.s32.totalorder %s4019_s8, %s4015_s7 }
   0x9   : > { %p46_p2 = scmp.eq.s32.totalorder %s4031_s11, 0  ;;  %p51_p3 = scmp.ne.s32.totalorder %s4015_s7, %s4011_s6 }
   0xa   : > { %s6808_s14 = smov (%p31_p0, %s29_s14), 0  ;;  %p52_p5 = scmp.eq.s32.totalorder %s3815_s12, 0 }
   0xb   : > { %p4107_p4 = por %p46_p2, %p45_p1  ;;  %s33_s17 = ssub.s32 %s4027_s10, %s6808_s14 }
   0xc   : > { %p77_p6 = scmp.eq.s32.totalorder %s3815_s12, 1  ;;  %p36_p7 = scmp.eq.s32.totalorder %s33_s17, 0 }
   0xd   : > { %p4113_p8 = por %p52_p5, %p51_p3  ;;  %p83_p10 = scmp.eq.s32.totalorder %s3816_s13, 1 }
   0xe   : > { %p4117_p9 = por %p77_p6, %p45_p1  ;;  %p3848_p13 = scmp.lt.s32.totalorder %s4031_s11, 2 }
   0xf   : > { %s4122_s20 = scalar_select %p36_p7, %s4019_s8, %s38_s15  }
  0x10   : > { %s6509_s19 = scalar_select %p4117_p9, 1, 0 }
  0x11   : > { %p4124_p11 = por %p83_p10, %p51_p3  ;;  %s103_s22 = sand.u32 1, %s4019_s8  }
  0x12   : > { %s3819_s23 = sshll.u32 %s103_s22, 6  ;;  %s3833_s24 = sshll.u32 %s4027_s10, 10 }
  0x13   : > { %s6510_s21 = scalar_select %p4124_p11, 1, 0 }
  0x14   : > { %s4135_s27 = scalar_lea.hbm %s6400_s0, %s3833_s24  ;;  %s107_s28 = scalar_lea.vmem [#allocation2], %s3819_s23 }
  0x15   : > { %s117_s29 = sshll.u32 %s107_s28, 4  ;;  %p4141_p0 = pnand %p3848_p13, %p4107_p4  ;;  %s4137_s29 = int_to_ptr.vmem [resolvable:$true] %s117_s29 }
  0x16   : > { %s4146_s2 = scalar_lea.sflag [#allocation3], %s103_s22  ;;  %s3919_s3 = scalar_lea.hbm %s4135_s27, 1024 }
  0x17   : > { %p3920_p2 = scmp.ne.s32.totalorder %s4135_s27, %s3919_s3  ;;  %p3921_p3 = pneg %p4141_p0 }
  0x18   : > { %s3924_s12 = scalar_lea.hbm %s6400_s0, 2048  ;;  %p3925_p4 = scmp.lt.u32.totalorder %s4135_s27, %s6400_s0 }
  0x19   : > { %p3922_p5 = pnand %p3921_p3, %p3920_p2  ;;  %p3926_p7 = scmp.lt.u32.totalorder %s3924_s12, %s3919_s3 }
  0x1a   : > { %p3928_p13 = scmp.lt.u32.totalorder %s3919_s3, %s4135_s27 }
  0x1b   : > { %p3923_p6 = pneg %p3922_p5  ;;  %p3927_p10 = por %p3926_p7, %p3925_p4 }
  0x1d   : > { %p3929_p12 = por %p3928_p13, %p3927_p10 }
  0x1f   : > { %p3930_p1 = pnand %p3929_p12, %p3923_p6 }
  0x21   : > { %3933 = shalt.err (!%p3930_p1)
}
  0x22   : > { %s3934_s16 = scalar_lea.vmem %s4137_s29, 1024  ;;  %s4033_s17 = smov [#allocation2]  }
  0x23   : > { %p3935_p2 = scmp.ne.s32.totalorder %s4137_s29, %s3934_s16  ;;  %s3939_s22 = sshll.u32 %s4033_s17, 4  ;;  %s3940_s22 = int_to_ptr.vmem [resolvable:$false] %s3939_s22 }
  0x24   : > { %s3941_s23 = scalar_lea.vmem %s3940_s22, 2048  ;;  %p3942_p9 = scmp.lt.s32.totalorder %s4137_s29, %s3940_s22 }
  0x25   : > { %p3937_p5 = pnand %p3935_p2, %p3921_p3  ;;  %p3943_p4 = scmp.lt.s32.totalorder %s3941_s23, %s3934_s16 }
  0x27   : > { %p3938_p11 = pneg %p3937_p5  ;;  %p3944_p7 = por %p3943_p4, %p3942_p9 }
  0x29   : > { %p3945_p10 = pnand %p3944_p7, %p3938_p11 }
  0x2b   : > { %3948 = shalt.err (!%p3945_p10)
}
  0x2c   : > { %s4034_s24 = smov 128   ;;  %s4035_s25 = smov 8  }
  0x2d   : > { %3843 = dma.hbm_to_vmem [thread:$0]  (!%p4141_p0), %s4135_s27, 1024, %s4137_s29, %s4146_s2, %s4034_s24, %s4034_s24, %s4035_s25  }
  0x2e   : > { %p125_p12 = scmp.lt.s32.totalorder %s4031_s11, 3  ;;  %p6512_p1 = scmp.ge.s32.totalorder %s4031_s11, 1 }
  0x30   : > { %p126_p3 = pnand %p6512_p1, %p125_p12 }
  0x32   : > { %129 = sbr.rel (%p126_p3) target bundleno = 917 (0x395), region = 24 }
  0x39   : > { %s4178_s26 = sand.u32 1, %s4015_s7  }
  0x3a   : > { %s3824_s28 = sshll.u32 %s4178_s26, 6  ;;  %s132_s3 = scalar_lea.sflag [#allocation3], %s4178_s26 }
  0x3b   : > { %s4184_s4 = scalar_lea.vmem [#allocation2], %s3824_s28 }
  0x3c   : > { %4002 = dma.done.wait (%p4113_p8), %s132_s3, 1024  }
  0x3d   : > { %4004 = vsyncadd (%p4113_p8), %s132_s3, 4294966272  ;;  %v166_v0 = vlaneseq  ;;  %v158_v4 = vld [vmem:[%s4184_s4] sm:$0xff]  ;;  %v159_v19 = vld [vmem:[%s4184_s4 + $0x8] sm:$0xff]  ;;  %v4036_v47 = vmov 1983009808   ;;  %s4038_s18 = smov 2  }
  0x3e   : > { %v160_v28 = vld [vmem:[%s4184_s4 + $0x10] sm:$0xff]  ;;  %v161_v37 = vld [vmem:[%s4184_s4 + $0x18] sm:$0xff]  ;;  %v873_v48 = vunpack.c.l.s4 %v4036_v47  ;;  %v162_v52 = vld [vmem:[%s4184_s4 + $0x20] sm:$0xff]  ;;  %s4039_s27 = smov 4   ;;  %s4040_s29 = smov 6   ;;  %vm3526_vm0 = vcmask 15360  }
  0x3f   : > { %v4190_v1 = vshrl.u32 %v166_v0, 7  ;;  %s4041_s30 = smov 8   ;;  %s4042_s2 = smov 10   ;;  %vm3535_vm1 = vcmask 31744   ;;  %vm3544_vm2 = vcmask 48128   ;;  %vm3553_vm3 = vcmask 64512  }
  0x40   : > { %v874_v53 = vunpack.c.0.s8 %v873_v48  ;;  %v163_v48 = vld [vmem:[%s4184_s4 + $0x28] sm:$0xff]  ;;  %s4043_s5 = smov 12   ;;  %s4044_s12 = smov 14   ;;  %vm3562_vm4 = vcmask 80896   ;;  %vm3571_vm5 = vcmask 97280   ;;  %vm3580_vm6 = vcmask 113664  }
  0x41   : > { %v4193_v2 = vsub.s32 1, %v4190_v1  ;;  %v4196_v3 = vsub.s32 0, %v4190_v1  ;;  %v4202_v7 = vsub.s32 2, %v4190_v1  ;;  %v4206_v9 = vsub.s32 3, %v4190_v1  ;;  %s4045_s13 = smov 16   ;;  %s4046_s15 = smov 18  }
  0x42   : > { %v4210_v11 = vsub.s32 4, %v4190_v1  ;;  %v4214_v13 = vsub.s32 5, %v4190_v1  ;;  %v4218_v15 = vsub.s32 6, %v4190_v1  ;;  %v4222_v17 = vsub.s32 7, %v4190_v1  ;;  %s4047_s16 = smov 20   ;;  %s4048_s17 = smov 22  }
  0x43   : > { %v180_v5 = vrot.slane %v158_v4, %v4193_v2  ;;  %v169_v6 = vrot.slane %v158_v4, %v4196_v3  ;;  %v191_v8 = vrot.slane %v158_v4, %v4202_v7  ;;  %v202_v10 = vrot.slane %v158_v4, %v4206_v9  ;;  %s4049_s22 = smov 24   ;;  %s4050_s23 = smov 26  }
  0x44   : > { %v213_v12 = vrot.slane %v158_v4, %v4210_v11  ;;  %v224_v14 = vrot.slane %v158_v4, %v4214_v13  ;;  %v235_v16 = vrot.slane %v158_v4, %v4218_v15  ;;  %v246_v18 = vrot.slane %v158_v4, %v4222_v17  ;;  %s4051_s24 = smov 28   ;;  %s4052_s25 = smov 30  }
  0x45   : > { %182 = vbcast.lane.b32.xlu1 %v180_v5, 256  ;;  %171 = vbcast.lane.b32.xlu0 %v169_v6, 256  ;;  %v257_v20 = vrot.slane %v159_v19, %v4196_v3  ;;  %v268_v21 = vrot.slane %v159_v19, %v4193_v2  ;;  %v279_v22 = vrot.slane %v159_v19, %v4202_v7  ;;  %vm3589_vm7 = vcmask 130048   ;;  %s4053_s3 = smov 32   ;;  %p6799_p9 = scmp.ne.s32.totalorder %s6509_s19, 0 }
  0x46   : > { %v290_v23 = vrot.slane %v159_v19, %v4206_v9  ;;  %v301_v24 = vrot.slane %v159_v19, %v4210_v11  ;;  %v312_v25 = vrot.slane %v159_v19, %v4214_v13  ;;  %v323_v26 = vrot.slane %v159_v19, %v4218_v15 }
  0x47   : > { %v334_v27 = vrot.slane %v159_v19, %v4222_v17  ;;  %v345_v29 = vrot.slane %v160_v28, %v4196_v3  ;;  %v356_v30 = vrot.slane %v160_v28, %v4193_v2  ;;  %v367_v31 = vrot.slane %v160_v28, %v4202_v7 }
  0x48   : > { %v378_v32 = vrot.slane %v160_v28, %v4206_v9  ;;  %v389_v33 = vrot.slane %v160_v28, %v4210_v11  ;;  %v400_v34 = vrot.slane %v160_v28, %v4214_v13  ;;  %v411_v35 = vrot.slane %v160_v28, %v4218_v15 }
  0x49   : > { %186 = vbcast.lane.b32.xlu1 %v180_v5, 264  ;;  %175 = vbcast.lane.b32.xlu0 %v169_v6, 264  ;;  %v422_v36 = vrot.slane %v160_v28, %v4222_v17  ;;  %v433_v38 = vrot.slane %v161_v37, %v4196_v3  ;;  %v444_v39 = vrot.slane %v161_v37, %v4193_v2  ;;  %vm3598_vm8 = vcmask 146432  }
  0x4a   : > { %v455_v40 = vrot.slane %v161_v37, %v4202_v7  ;;  %v466_v41 = vrot.slane %v161_v37, %v4206_v9  ;;  %v477_v42 = vrot.slane %v161_v37, %v4210_v11  ;;  %v488_v43 = vrot.slane %v161_v37, %v4214_v13 }
  0x4b   : > { %v499_v46 = vrot.slane %v161_v37, %v4218_v15  ;;  %v510_v51 = vrot.slane %v161_v37, %v4222_v17  ;;  %v521_v56 = vrot.slane %v162_v52, %v4196_v3  ;;  %v4267_v57 = vsub.s32 %v874_v53, %v4190_v1 }
  0x4c   : > { %v532_v62 = vrot.slane %v162_v52, %v4193_v2  ;;  %vm3607_vm9 = vcmask 162816   ;;  %vm3616_vm10 = vcmask 179200   ;;  %vm3625_vm11 = vcmask 195584  }
  0x4d   : > { %197 = vbcast.lane.b32.xlu1 %v191_v8, 264  ;;  %193 = vbcast.lane.b32.xlu0 %v191_v8, 256  ;;  %v543_v8 = vrot.slane %v162_v52, %v4202_v7  ;;  %vm3634_vm12 = vcmask 211968   ;;  %vm3643_vm13 = vcmask 228352   ;;  %vm3652_vm14 = vcmask 244736  }
  0x4e   : > { %vm3693_vm15 = vcmask 261120  }
  0x51   : > { %208 = vbcast.lane.b32.xlu1 %v202_v10, 264  ;;  %204 = vbcast.lane.b32.xlu0 %v202_v10, 256 }
  0x55   : > { %219 = vbcast.lane.b32.xlu1 %v213_v12, 264  ;;  %215 = vbcast.lane.b32.xlu0 %v213_v12, 256 }
  0x59   : > { %230 = vbcast.lane.b32.xlu1 %v224_v14, 264  ;;  %226 = vbcast.lane.b32.xlu0 %v224_v14, 256  ;;  %v554_v14 = vrot.slane %v162_v52, %v4206_v9 }
  0x5d   : > { %241 = vbcast.lane.b32.xlu1 %v235_v16, 264  ;;  %237 = vbcast.lane.b32.xlu0 %v235_v16, 256  ;;  %v4037_v16 = vmov 1934713408  }
  0x61   : > { %252 = vbcast.lane.b32.xlu1 %v246_v18, 264  ;;  %248 = vbcast.lane.b32.xlu0 %v246_v18, 256  ;;  %v937_v18 = vunpack.c.l.s4 %v4037_v16  ;;  %v631_v16 = vrot.slane %v163_v48, %v4202_v7 }
  0x65   : > { %263 = vbcast.lane.b32.xlu1 %v257_v20, 264  ;;  %259 = vbcast.lane.b32.xlu0 %v257_v20, 256 }
  0x69   : > { %274 = vbcast.lane.b32.xlu1 %v268_v21, 264  ;;  %270 = vbcast.lane.b32.xlu0 %v268_v21, 256  ;;  %v565_v21 = vrot.slane %v162_v52, %v4210_v11 }
  0x6d   : > { %285 = vbcast.lane.b32.xlu1 %v279_v22, 264  ;;  %281 = vbcast.lane.b32.xlu0 %v279_v22, 256  ;;  %v938_v22 = vunpack.c.0.s8 %v937_v18 }
  0x71   : > { %296 = vbcast.lane.b32.xlu1 %v290_v23, 264  ;;  %292 = vbcast.lane.b32.xlu0 %v290_v23, 256 }
  0x75   : > { %307 = vbcast.lane.b32.xlu1 %v301_v24, 264  ;;  %303 = vbcast.lane.b32.xlu0 %v301_v24, 256 }
  0x79   : > { %318 = vbcast.lane.b32.xlu1 %v312_v25, 264  ;;  %314 = vbcast.lane.b32.xlu0 %v312_v25, 256 }
  0x7d   : > { %329 = vbcast.lane.b32.xlu1 %v323_v26, 264  ;;  %325 = vbcast.lane.b32.xlu0 %v323_v26, 256 }
  0x81   : > { %340 = vbcast.lane.b32.xlu1 %v334_v27, 264  ;;  %336 = vbcast.lane.b32.xlu0 %v334_v27, 256  ;;  %v576_v27 = vrot.slane %v162_v52, %v4214_v13 }
  0x85   : > { %351 = vbcast.lane.b32.xlu1 %v345_v29, 264  ;;  %347 = vbcast.lane.b32.xlu0 %v345_v29, 256  ;;  %v4306_v29 = vsub.s32 %v938_v22, %v4190_v1  ;;  %v642_v22 = vrot.slane %v163_v48, %v4206_v9 }
  0x89   : > { %362 = vbcast.lane.b32.xlu1 %v356_v30, 264  ;;  %358 = vbcast.lane.b32.xlu0 %v356_v30, 256 }
  0x8d   : > { %373 = vbcast.lane.b32.xlu1 %v367_v31, 264  ;;  %369 = vbcast.lane.b32.xlu0 %v367_v31, 256 }
  0x91   : > { %384 = vbcast.lane.b32.xlu1 %v378_v32, 264  ;;  %380 = vbcast.lane.b32.xlu0 %v378_v32, 256 }
  0x95   : > { %395 = vbcast.lane.b32.xlu1 %v389_v33, 264  ;;  %391 = vbcast.lane.b32.xlu0 %v389_v33, 256 }
  0x99   : > { %406 = vbcast.lane.b32.xlu1 %v400_v34, 264  ;;  %402 = vbcast.lane.b32.xlu0 %v400_v34, 256 }
  0x9d   : > { %417 = vbcast.lane.b32.xlu1 %v411_v35, 264  ;;  %413 = vbcast.lane.b32.xlu0 %v411_v35, 256 }
  0xa1   : > { %428 = vbcast.lane.b32.xlu1 %v422_v36, 264  ;;  %424 = vbcast.lane.b32.xlu0 %v422_v36, 256  ;;  %v587_v36 = vrot.slane %v162_v52, %v4218_v15 }
  0xa5   : > { %439 = vbcast.lane.b32.xlu1 %v433_v38, 264  ;;  %435 = vbcast.lane.b32.xlu0 %v433_v38, 256 }
  0xa9   : > { %450 = vbcast.lane.b32.xlu1 %v444_v39, 264  ;;  %446 = vbcast.lane.b32.xlu0 %v444_v39, 256 }
  0xad   : > { %461 = vbcast.lane.b32.xlu1 %v455_v40, 264  ;;  %457 = vbcast.lane.b32.xlu0 %v455_v40, 256 }
  0xb1   : > { %472 = vbcast.lane.b32.xlu1 %v466_v41, 264  ;;  %468 = vbcast.lane.b32.xlu0 %v466_v41, 256 }
  0xb5   : > { %483 = vbcast.lane.b32.xlu1 %v477_v42, 264  ;;  %479 = vbcast.lane.b32.xlu0 %v477_v42, 256  ;;  %v598_v42 = vrot.slane %v162_v52, %v4222_v17 }
  0xb7   : > { %v4250_v44 = vpop.permute.xlu1 %182  ;;  %v4252_v45 = vpop.permute.xlu0 %171 }
  0xb9   : > { %494 = vbcast.lane.b32.xlu1 %v488_v43, 264  ;;  %490 = vbcast.lane.b32.xlu0 %v488_v43, 256 }
  0xbb   : > { %v4255_v49 = vpop.permute.xlu1 %186  ;;  %v4257_v50 = vpop.permute.xlu0 %175 }
  0xbc   : > { %6513 = vst [vmem:[#allocation8_spill] sm:$0xff] %v4255_v49  ;;  %6514 = vst [vmem:[#allocation9_spill] sm:$0xff] %v4257_v50 }
  0xbd   : > { %505 = vbcast.lane.b32.xlu1 %v499_v46, 264  ;;  %501 = vbcast.lane.b32.xlu0 %v499_v46, 256 }
  0xbf   : > { %v4261_v54 = vpop.permute.xlu1 %197  ;;  %v4263_v55 = vpop.permute.xlu0 %193 }
  0xc0   : > { %6515 = vst [vmem:[#allocation10_spill] sm:$0xff] %v4261_v54  ;;  %v870_v58 = vcombine.low %v4252_v45, %v4263_v55 }
  0xc1   : > { %516 = vbcast.lane.b32.xlu1 %v510_v51, 264  ;;  %512 = vbcast.lane.b32.xlu0 %v510_v51, 256 }
  0xc2   : > { %v878_v0 = vrot.slane %v870_v58, %v4267_v57 }
  0xc3   : > { %v4271_v59 = vpop.permute.xlu1 %208  ;;  %v4273_v60 = vpop.permute.xlu0 %204 }
  0xc4   : > { %6516 = vst [vmem:[#allocation11_spill] sm:$0xff] %v4271_v59  ;;  %v886_v61 = vcombine.low %v4250_v44, %v4273_v60 }
  0xc5   : > { %527 = vbcast.lane.b32.xlu1 %v521_v56, 264  ;;  %523 = vbcast.lane.b32.xlu0 %v521_v56, 256  ;;  %v609_v56 = vrot.slane %v163_v48, %v4196_v3 }
  0xc6   : > { %v894_v63 = vrot.slane %v886_v61, %v4267_v57 }
  0xc7   : > { %v4280_v4 = vpop.permute.xlu1 %219  ;;  %v4282_v5 = vpop.permute.xlu0 %215 }
  0xc8   : > { %6517 = vst [vmem:[#allocation12_spill] sm:$0xff] %v4280_v4  ;;  %v935_v6 = vcombine.high %v878_v0, %v894_v63  ;;  %v934_v30 = vcombine.low %v878_v0, %v894_v63  ;;  %v620_v63 = vrot.slane %v163_v48, %v4193_v2 }
  0xc9   : > { %538 = vbcast.lane.b32.xlu1 %v532_v62, 264  ;;  %534 = vbcast.lane.b32.xlu0 %v532_v62, 256 }
  0xca   : > { %v4319_v1 = vrot.slane %v934_v30, %v4306_v29  ;;  %v4325_v40 = vrot.slane %v935_v6, %v4306_v29 }
  0xcb   : > { %v4285_v10 = vpop.permute.xlu1 %230  ;;  %v4287_v12 = vpop.permute.xlu0 %226 }
  0xcc   : > { %6518 = vst [vmem:[#allocation13_spill] sm:$0xff] %v4285_v10  ;;  %6525 = vst [vmem:[#allocation20_spill] sm:$0xff] %v4319_v1 }
  0xcd   : > { %549 = vbcast.lane.b32.xlu1 %v543_v8, 264  ;;  %545 = vbcast.lane.b32.xlu0 %v543_v8, 256 }
  0xcf   : > { %v4290_v19 = vpop.permute.xlu1 %241  ;;  %v4292_v20 = vpop.permute.xlu0 %237 }
  0xd0   : > { %6519 = vst [vmem:[#allocation14_spill] sm:$0xff] %v4290_v19  ;;  %v902_v23 = vcombine.low %v4282_v5, %v4292_v20 }
  0xd1   : > { %560 = vbcast.lane.b32.xlu1 %v554_v14, 264  ;;  %556 = vbcast.lane.b32.xlu0 %v554_v14, 256 }
  0xd2   : > { %v910_v31 = vrot.slane %v902_v23, %v4267_v57 }
  0xd3   : > { %v4297_v24 = vpop.permute.xlu1 %252  ;;  %v4299_v25 = vpop.permute.xlu0 %248 }
  0xd4   : > { %6520 = vst [vmem:[#allocation15_spill] sm:$0xff] %v4297_v24  ;;  %v918_v26 = vcombine.low %v4287_v12, %v4299_v25 }
  0xd5   : > { %571 = vbcast.lane.b32.xlu1 %v565_v21, 264  ;;  %567 = vbcast.lane.b32.xlu0 %v565_v21, 256 }
  0xd6   : > { %v926_v28 = vrot.slane %v918_v26, %v4267_v57 }
  0xd7   : > { %v4309_v32 = vpop.permute.xlu1 %263  ;;  %v4311_v33 = vpop.permute.xlu0 %259 }
  0xd8   : > { %6521 = vst [vmem:[#allocation16_spill] sm:$0xff] %v4309_v32  ;;  %6522 = vst [vmem:[#allocation17_spill] sm:$0xff] %v4311_v33  ;;  %v966_v34 = vcombine.low %v910_v31, %v926_v28  ;;  %v967_v35 = vcombine.high %v910_v31, %v926_v28 }
  0xd9   : > { %582 = vbcast.lane.b32.xlu1 %v576_v27, 264  ;;  %578 = vbcast.lane.b32.xlu0 %v576_v27, 256  ;;  %v653_v27 = vrot.slane %v163_v48, %v4210_v11 }
  0xda   : > { %v4322_v39 = vrot.slane %v966_v34, %v4306_v29  ;;  %v4328_v41 = vrot.slane %v967_v35, %v4306_v29  ;;  %v664_v34 = vrot.slane %v163_v48, %v4214_v13 }
  0xdb   : > { %v4314_v37 = vpop.permute.xlu1 %274  ;;  %v4316_v38 = vpop.permute.xlu0 %270 }
  0xdc   : > { %6523 = vst [vmem:[#allocation18_spill] sm:$0xff] %v4314_v37  ;;  %6524 = vst [vmem:[#allocation19_spill] sm:$0xff] %v4316_v38 }
  0xdd   : > { %6526 = vst [vmem:[#allocation21_spill] sm:$0xff] %v4322_v39  ;;  %593 = vbcast.lane.b32.xlu1 %v587_v36, 264  ;;  %589 = vbcast.lane.b32.xlu0 %v587_v36, 256 }
  0xdf   : > { %v4338_v51 = vpop.permute.xlu1 %285  ;;  %v4340_v53 = vpop.permute.xlu0 %281 }
  0xe0   : > { %6527 = vst [vmem:[#allocation22_spill] sm:$0xff] %v4338_v51  ;;  %6528 = vst [vmem:[#allocation23_spill] sm:$0xff] %v4340_v53  ;;  %v1006_v52 = vcombine.low %v4311_v33, %v4340_v53 }
  0xe1   : > { %604 = vbcast.lane.b32.xlu1 %v598_v42, 264  ;;  %600 = vbcast.lane.b32.xlu0 %v598_v42, 256 }
  0xe2   : > { %v1014_v6 = vrot.slane %v1006_v52, %v4267_v57 }
  0xe3   : > { %v4345_v58 = vpop.permute.xlu0 %292  ;;  %v4347_v61 = vpop.permute.xlu1 %296 }
  0xe4   : > { %6529 = vst [vmem:[#allocation24_spill] sm:$0xff] %v4345_v58  ;;  %6530 = vst [vmem:[#allocation25_spill] sm:$0xff] %v4347_v61  ;;  %v1022_v62 = vcombine.low %v4316_v38, %v4345_v58 }
  0xe5   : > { %615 = vbcast.lane.b32.xlu1 %v609_v56, 264  ;;  %611 = vbcast.lane.b32.xlu0 %v609_v56, 256 }
  0xe6   : > { %v1030_v0 = vrot.slane %v1022_v62, %v4267_v57 }
  0xe7   : > { %v4354_v8 = vpop.permute.xlu0 %303  ;;  %v4357_v18 = vpop.permute.xlu1 %307 }
  0xe8   : > { %6531 = vst [vmem:[#allocation26_spill] sm:$0xff] %v4354_v8  ;;  %v1071_v14 = vcombine.high %v1014_v6, %v1030_v0  ;;  %6532 = vst [vmem:[#allocation27_spill] sm:$0xff] %v4357_v18  ;;  %v1070_v42 = vcombine.low %v1014_v6, %v1030_v0 }
  0xe9   : > { %626 = vbcast.lane.b32.xlu1 %v620_v63, 264  ;;  %622 = vbcast.lane.b32.xlu0 %v620_v63, 256 }
  0xea   : > { %v4384_v47 = vrot.slane %v1070_v42, %v4306_v29  ;;  %v4390_v0 = vrot.slane %v1071_v14, %v4306_v29  ;;  %v164_v14 = vld [vmem:[%s4184_s4 + $0x30] sm:$0xff] }
  0xeb   : > { %v4359_v21 = vpop.permute.xlu0 %314  ;;  %v4364_v26 = vpop.permute.xlu1 %318  ;;  %v752_v51 = vrot.slane %v164_v14, %v4214_v13 }
  0xec   : > { %6533 = vst [vmem:[#allocation28_spill] sm:$0xff] %v4359_v21  ;;  %6535 = vst [vmem:[#allocation30_spill] sm:$0xff] %v4364_v26 }
  0xed   : > { %637 = vbcast.lane.b32.xlu1 %v631_v16, 264  ;;  %633 = vbcast.lane.b32.xlu0 %v631_v16, 256  ;;  %v675_v16 = vrot.slane %v163_v48, %v4218_v15  ;;  %6537 = vst [vmem:[#allocation32_spill] sm:$0xff] %v4384_v47 }
  0xef   : > { %v4362_v23 = vpop.permute.xlu0 %325  ;;  %v4374_v35 = vpop.permute.xlu1 %329 }
  0xf0   : > { %6534 = vst [vmem:[#allocation29_spill] sm:$0xff] %v4362_v23  ;;  %v1038_v28 = vcombine.low %v4354_v8, %v4362_v23  ;;  %6536 = vst [vmem:[#allocation31_spill] sm:$0xff] %v4374_v35  ;;  %v730_v35 = vrot.slane %v164_v14, %v4206_v9 }
  0xf1   : > { %648 = vbcast.lane.b32.xlu1 %v642_v22, 264  ;;  %644 = vbcast.lane.b32.xlu0 %v642_v22, 256 }
  0xf2   : > { %v1046_v56 = vrot.slane %v1038_v28, %v4267_v57  ;;  %v686_v28 = vrot.slane %v163_v48, %v4222_v17 }
  0xf3   : > { %v4369_v30 = vpop.permute.xlu0 %336 }
  0xf4   : > { %v1054_v31 = vcombine.low %v4359_v21, %v4369_v30 }
  0xf5   : > { %659 = vbcast.lane.b32.xlu1 %v653_v27, 264  ;;  %655 = vbcast.lane.b32.xlu0 %v653_v27, 256  ;;  %v4395_v27 = vpop.permute.xlu1 %340 }
  0xf6   : > { %v1062_v36 = vrot.slane %v1054_v31, %v4267_v57  ;;  %6539 = vst [vmem:[#allocation34_spill] sm:$0xff] %v4395_v27  ;;  %v719_v27 = vrot.slane %v164_v14, %v4202_v7 }
  0xf7   : > { %v4378_v52 = vpop.permute.xlu0 %347 }
  0xf8   : > { %v1102_v62 = vcombine.low %v1046_v56, %v1062_v36  ;;  %v1103_v63 = vcombine.high %v1046_v56, %v1062_v36 }
  0xf9   : > { %670 = vbcast.lane.b32.xlu1 %v664_v34, 264  ;;  %666 = vbcast.lane.b32.xlu0 %v664_v34, 256 }
  0xfa   : > { %v4387_v31 = vrot.slane %v1102_v62, %v4306_v29  ;;  %v4393_v6 = vrot.slane %v1103_v63, %v4306_v29  ;;  %v697_v62 = vrot.slane %v164_v14, %v4196_v3  ;;  %v4408_v63 = vpop.permute.xlu1 %351 }
  0xfb   : > { %v4381_v22 = vpop.permute.xlu0 %358  ;;  %6540 = vst [vmem:[#allocation35_spill] sm:$0xff] %v4408_v63 }
  0xfc   : > { %6538 = vst [vmem:[#allocation33_spill] sm:$0xff] %v4387_v31 }
  0xfd   : > { %681 = vbcast.lane.b32.xlu1 %v675_v16, 264  ;;  %677 = vbcast.lane.b32.xlu0 %v675_v16, 256  ;;  %v708_v16 = vrot.slane %v164_v14, %v4193_v2 }
  0xfe   : > { %v4421_v26 = vpop.permute.xlu1 %362 }
  0xff   : > { %v4405_v56 = vpop.permute.xlu0 %369  ;;  %6541 = vst [vmem:[#allocation36_spill] sm:$0xff] %v4421_v26 }
 0x100   : > { %v1414_v48 = vcombine.low %v4378_v52, %v4405_v56 }
 0x101   : > { %692 = vbcast.lane.b32.xlu1 %v686_v28, 264  ;;  %688 = vbcast.lane.b32.xlu0 %v686_v28, 256 }
 0x102   : > { %v1422_v46 = vrot.slane %v1414_v48, %v4267_v57  ;;  %v4427_v37 = vpop.permute.xlu1 %373 }
 0x103   : > { %v4412_v34 = vpop.permute.xlu0 %380  ;;  %6542 = vst [vmem:[#allocation37_spill] sm:$0xff] %v4427_v37 }
 0x104   : > { %v1430_v36 = vcombine.low %v4381_v22, %v4412_v34 }
 0x105   : > { %703 = vbcast.lane.b32.xlu1 %v697_v62, 264  ;;  %699 = vbcast.lane.b32.xlu0 %v697_v62, 256  ;;  %v741_v62 = vrot.slane %v164_v14, %v4210_v11 }
 0x106   : > { %v1438_v42 = vrot.slane %v1430_v36, %v4267_v57 }
 0x107   : > { %v4419_v43 = vpop.permute.xlu0 %391 }
 0x108   : > { %v1479_v28 = vcombine.high %v1422_v46, %v1438_v42  ;;  %v1478_v26 = vcombine.low %v1422_v46, %v1438_v42 }
 0x109   : > { %714 = vbcast.lane.b32.xlu1 %v708_v16, 264  ;;  %710 = vbcast.lane.b32.xlu0 %v708_v16, 256  ;;  %v4436_v16 = vpop.permute.xlu1 %384 }
 0x10a   : > { %6543 = vst [vmem:[#allocation38_spill] sm:$0xff] %v4436_v16  ;;  %v763_v16 = vrot.slane %v164_v14, %v4218_v15  ;;  %v4451_v24 = vrot.slane %v1478_v26, %v4306_v29  ;;  %v4457_v46 = vrot.slane %v1479_v28, %v4306_v29 }
 0x10b   : > { %v4424_v18 = vpop.permute.xlu0 %402 }
 0x10c   : > { %6547 = vst [vmem:[#allocation42_spill] sm:$0xff] %v4451_v24 }
 0x10d   : > { %725 = vbcast.lane.b32.xlu1 %v719_v27, 264  ;;  %721 = vbcast.lane.b32.xlu0 %v719_v27, 256  ;;  %v4446_v54 = vpop.permute.xlu1 %395 }
 0x10e   : > { %6545 = vst [vmem:[#allocation40_spill] sm:$0xff] %v4446_v54 }
 0x10f   : > { %v4429_v36 = vpop.permute.xlu0 %413 }
 0x110   : > { %v1446_v48 = vcombine.low %v4419_v43, %v4429_v36 }
 0x111   : > { %736 = vbcast.lane.b32.xlu1 %v730_v35, 264  ;;  %732 = vbcast.lane.b32.xlu0 %v730_v35, 256  ;;  %v4472_v28 = vpop.permute.xlu1 %406 }
 0x112   : > { %v1454_v63 = vrot.slane %v1446_v48, %v4267_v57  ;;  %6550 = vst [vmem:[#allocation45_spill] sm:$0xff] %v4472_v28 }
 0x113   : > { %v4434_v61 = vpop.permute.xlu0 %424 }
 0x114   : > { %v1462_v32 = vcombine.low %v4424_v18, %v4434_v61 }
 0x115   : > { %747 = vbcast.lane.b32.xlu1 %v741_v62, 264  ;;  %743 = vbcast.lane.b32.xlu0 %v741_v62, 256  ;;  %v4482_v26 = vpop.permute.xlu1 %417 }
 0x116   : > { %v1470_v27 = vrot.slane %v1462_v32, %v4267_v57  ;;  %6552 = vst [vmem:[#allocation47_spill] sm:$0xff] %v4482_v26 }
 0x117   : > { %v4443_v35 = vpop.permute.xlu0 %435 }
 0x118   : > { %6544 = vst [vmem:[#allocation39_spill] sm:$0xff] %v4443_v35  ;;  %v1510_v37 = vcombine.low %v1454_v63, %v1470_v27  ;;  %v1511_v50 = vcombine.high %v1454_v63, %v1470_v27  ;;  %v774_v63 = vrot.slane %v164_v14, %v4222_v17 }
 0x119   : > { %758 = vbcast.lane.b32.xlu1 %v752_v51, 264  ;;  %754 = vbcast.lane.b32.xlu0 %v752_v51, 256  ;;  %v4491_v19 = vpop.permute.xlu1 %428 }
 0x11a   : > { %v4454_v32 = vrot.slane %v1510_v37, %v4306_v29  ;;  %v4460_v42 = vrot.slane %v1511_v50, %v4306_v29  ;;  %v165_v37 = vld [vmem:[%s4184_s4 + $0x38] sm:$0xff]  ;;  %6555 = vst [vmem:[#allocation50_spill] sm:$0xff] %v4491_v19  ;;  %s153_s4 = scalar_lea.vmem [#allocation5], %s3824_s28 }
 0x11b   : > { %v4448_v10 = vpop.permute.xlu0 %446  ;;  %v785_v50 = vrot.slane %v165_v37, %v4196_v3  ;;  %v807_v54 = vrot.slane %v165_v37, %v4202_v7  ;;  %s3728_s28 = sshll.u32 %s153_s4, 4  ;;  %s6343_s28 = int_to_ptr.vmem [resolvable:$true] %s3728_s28 }
 0x11c   : > { %6546 = vst [vmem:[#allocation41_spill] sm:$0xff] %v4448_v10  ;;  %6548 = vst [vmem:[#allocation43_spill] sm:$0xff] %v4454_v32 }
 0x11d   : > { %769 = vbcast.lane.b32.xlu1 %v763_v16, 264  ;;  %765 = vbcast.lane.b32.xlu0 %v763_v16, 256  ;;  %v796_v16 = vrot.slane %v165_v37, %v4193_v2  ;;  %v818_v2 = vrot.slane %v165_v37, %v4206_v9  ;;  %v840_v9 = vrot.slane %v165_v37, %v4214_v13 }
 0x11f   : > { %v4470_v48 = vpop.permute.xlu0 %457 }
 0x120   : > { %6549 = vst [vmem:[#allocation44_spill] sm:$0xff] %v4470_v48  ;;  %v1550_v14 = vcombine.low %v4443_v35, %v4470_v48  ;;  %v851_v35 = vrot.slane %v165_v37, %v4218_v15 }
 0x121   : > { %780 = vbcast.lane.b32.xlu1 %v774_v63, 264  ;;  %776 = vbcast.lane.b32.xlu0 %v774_v63, 256 }
 0x122   : > { %v1558_v28 = vrot.slane %v1550_v14, %v4267_v57 }
 0x123   : > { %v4477_v27 = vpop.permute.xlu0 %468 }
 0x124   : > { %6551 = vst [vmem:[#allocation46_spill] sm:$0xff] %v4477_v27  ;;  %v1566_v62 = vcombine.low %v4448_v10, %v4477_v27 }
 0x125   : > { %791 = vbcast.lane.b32.xlu1 %v785_v50, 264  ;;  %787 = vbcast.lane.b32.xlu0 %v785_v50, 256  ;;  %v4497_v50 = vpop.permute.xlu1 %439 }
 0x126   : > { %v1574_v51 = vrot.slane %v1566_v62, %v4267_v57  ;;  %v829_v62 = vrot.slane %v165_v37, %v4210_v11  ;;  %6557 = vst [vmem:[#allocation52_spill] sm:$0xff] %v4497_v50 }
 0x127   : > { %v4486_v3 = vpop.permute.xlu0 %479 }
 0x128   : > { %6553 = vst [vmem:[#allocation48_spill] sm:$0xff] %v4486_v3  ;;  %v1615_v63 = vcombine.high %v1558_v28, %v1574_v51  ;;  %v1614_v19 = vcombine.low %v1558_v28, %v1574_v51 }
 0x129   : > { %802 = vbcast.lane.b32.xlu1 %v796_v16, 264  ;;  %798 = vbcast.lane.b32.xlu0 %v796_v16, 256 }
 0x12a   : > { %v4514_v48 = vrot.slane %v1614_v19, %v4306_v29  ;;  %v4520_v51 = vrot.slane %v1615_v63, %v4306_v29  ;;  %v1543_v19 = vcombine.high %v4451_v24, %v4454_v32 }
 0x12b   : > { %v4489_v4 = vpop.permute.xlu0 %490 }
 0x12c   : > { %6554 = vst [vmem:[#allocation49_spill] sm:$0xff] %v4489_v4  ;;  %6560 = vst [vmem:[#allocation55_spill] sm:$0xff] %v4514_v48 }
 0x12d   : > { %813 = vbcast.lane.b32.xlu1 %v807_v54, 264  ;;  %809 = vbcast.lane.b32.xlu0 %v807_v54, 256 }
 0x12f   : > { %v4494_v26 = vpop.permute.xlu0 %501 }
 0x130   : > { %6556 = vst [vmem:[#allocation51_spill] sm:$0xff] %v4494_v26  ;;  %v1582_v7 = vcombine.low %v4486_v3, %v4494_v26 }
 0x131   : > { %824 = vbcast.lane.b32.xlu1 %v818_v2, 264  ;;  %820 = vbcast.lane.b32.xlu0 %v818_v2, 256  ;;  %v4510_v2 = vpop.permute.xlu1 %450 }
 0x132   : > { %v1590_v11 = vrot.slane %v1582_v7, %v4267_v57  ;;  %6559 = vst [vmem:[#allocation54_spill] sm:$0xff] %v4510_v2  ;;  %v862_v7 = vrot.slane %v165_v37, %v4222_v17  ;;  %v1135_v17 = vcombine.high %v4384_v47, %v4387_v31 }
 0x133   : > { %v4501_v14 = vpop.permute.xlu0 %512 }
 0x134   : > { %6558 = vst [vmem:[#allocation53_spill] sm:$0xff] %v4501_v14  ;;  %v1598_v16 = vcombine.low %v4489_v4, %v4501_v14 }
 0x135   : > { %835 = vbcast.lane.b32.xlu1 %v829_v62, 264  ;;  %831 = vbcast.lane.b32.xlu0 %v829_v62, 256 }
 0x136   : > { %v1606_v54 = vrot.slane %v1598_v16, %v4267_v57  ;;  %v4534_v16 = vpop.permute.xlu1 %461 }
 0x137   : > { %v4508_v49 = vpop.permute.xlu0 %523  ;;  %6562 = vst [vmem:[#allocation57_spill] sm:$0xff] %v4534_v16 }
 0x138   : > { %v1646_v50 = vcombine.low %v1590_v11, %v1606_v54  ;;  %v1647_v59 = vcombine.high %v1590_v11, %v1606_v54  ;;  %v999_v54 = vcombine.high %v4319_v1, %v4322_v39 }
 0x139   : > { %846 = vbcast.lane.b32.xlu1 %v840_v9, 264  ;;  %842 = vbcast.lane.b32.xlu0 %v840_v9, 256 }
 0x13a   : > { %v4517_v13 = vrot.slane %v1646_v50, %v4306_v29  ;;  %v4523_v28 = vrot.slane %v1647_v59, %v4306_v29  ;;  %v4542_v37 = vpop.permute.xlu1 %472 }
 0x13b   : > { %v4525_v62 = vpop.permute.xlu0 %534  ;;  %6563 = vst [vmem:[#allocation58_spill] sm:$0xff] %v4542_v37 }
 0x13c   : > { %6561 = vst [vmem:[#allocation56_spill] sm:$0xff] %v4517_v13  ;;  %v1679_v15 = vcombine.high %v4514_v48, %v4517_v13 }
 0x13d   : > { %857 = vbcast.lane.b32.xlu1 %v851_v35, 264  ;;  %853 = vbcast.lane.b32.xlu0 %v851_v35, 256 }
 0x13e   : > { %v4561_v47 = vpop.permute.xlu1 %483 }
 0x13f   : > { %v4536_v63 = vpop.permute.xlu0 %545  ;;  %6564 = vst [vmem:[#allocation59_spill] sm:$0xff] %v4561_v47 }
 0x140   : > { %v1958_v59 = vcombine.low %v4508_v49, %v4536_v63 }
 0x141   : > { %868 = vbcast.lane.b32.xlu1 %v862_v7, 264  ;;  %864 = vbcast.lane.b32.xlu0 %v862_v7, 256 }
 0x142   : > { %v1966_v11 = vrot.slane %v1958_v59, %v4267_v57  ;;  %v4566_v59 = vpop.permute.xlu1 %494 }
 0x143   : > { %v4544_v9 = vpop.permute.xlu0 %556  ;;  %6565 = vst [vmem:[#allocation60_spill] sm:$0xff] %v4566_v59 }
 0x144   : > { %v1974_v35 = vcombine.low %v4525_v62, %v4544_v9 }
 0x145   : > { %3056 = vrot.lane.b32.xlu1 %v1135_v17, %s4038_s18  ;;  %3054 = vrot.lane.b32.xlu0 %v999_v54, %s4038_s18 }
 0x146   : > { %v1982_v7 = vrot.slane %v1974_v35, %v4267_v57  ;;  %v4576_v32 = vpop.permute.xlu1 %505 }
 0x147   : > { %v4556_v50 = vpop.permute.xlu0 %567  ;;  %6566 = vst [vmem:[#allocation61_spill] sm:$0xff] %v4576_v32 }
 0x148   : > { %v2023_v31 = vcombine.high %v1966_v11, %v1982_v7 }
 0x149   : > { %3060 = vrot.lane.b32.xlu1 %v1679_v15, %s4038_s18  ;;  %3058 = vrot.lane.b32.xlu0 %v1543_v19, %s4038_s18  ;;  %v2022_v15 = vcombine.low %v1966_v11, %v1982_v7 }
 0x14a   : > { %v4589_v37 = vrot.slane %v2023_v31, %v4306_v29  ;;  %v4594_v11 = vpop.permute.xlu1 %516 }
 0x14b   : > { %v4564_v17 = vpop.permute.xlu0 %578  ;;  %v4583_v47 = vrot.slane %v2022_v15, %v4306_v29  ;;  %6570 = vst [vmem:[#allocation65_spill] sm:$0xff] %v4594_v11 }
 0x14d   : > { %6568 = vst [vmem:[#allocation63_spill] sm:$0xff] %v4583_v47 }
 0x14f   : > { %v4568_v54 = vpop.permute.xlu0 %589 }
 0x150   : > { %v1990_v35 = vcombine.low %v4556_v50, %v4568_v54 }
 0x152   : > { %v1998_v24 = vrot.slane %v1990_v35, %v4267_v57  ;;  %v4609_v35 = vpop.permute.xlu1 %527 }
 0x153   : > { %v4572_v13 = vpop.permute.xlu0 %600  ;;  %6573 = vst [vmem:[#allocation68_spill] sm:$0xff] %v4609_v35 }
 0x154   : > { %v2006_v48 = vcombine.low %v4564_v17, %v4572_v13 }
 0x156   : > { %v2014_v19 = vrot.slane %v2006_v48, %v4267_v57  ;;  %v4619_v16 = vpop.permute.xlu1 %538 }
 0x157   : > { %v4580_v39 = vpop.permute.xlu0 %611  ;;  %6575 = vst [vmem:[#allocation70_spill] sm:$0xff] %v4619_v16 }
 0x158   : > { %6567 = vst [vmem:[#allocation62_spill] sm:$0xff] %v4580_v39  ;;  %v2054_v1 = vcombine.low %v1998_v24, %v2014_v19  ;;  %v2055_v59 = vcombine.high %v1998_v24, %v2014_v19 }
 0x15a   : > { %v4586_v2 = vrot.slane %v2054_v1, %v4306_v29  ;;  %v4592_v32 = vrot.slane %v2055_v59, %v4306_v29 }
 0x15b   : > { %v4596_v7 = vpop.permute.xlu0 %622 }
 0x15c   : > { %6569 = vst [vmem:[#allocation64_spill] sm:$0xff] %v4586_v2  ;;  %6571 = vst [vmem:[#allocation66_spill] sm:$0xff] %v4596_v7  ;;  %v2087_v48 = vcombine.high %v4583_v47, %v4586_v2  ;;  %v4625_v47 = vpop.permute.xlu1 %549 }
 0x15d   : > { %6578 = vst [vmem:[#allocation73_spill] sm:$0xff] %v4625_v47 }
 0x15e   : > { %3062 = vrot.lane.b32.xlu0 %v2087_v48, %s4038_s18 }
 0x15f   : > { %v4607_v59 = vpop.permute.xlu0 %633 }
 0x160   : > { %6572 = vst [vmem:[#allocation67_spill] sm:$0xff] %v4607_v59  ;;  %v2094_v15 = vcombine.low %v4580_v39, %v4607_v59  ;;  %v4631_v59 = vpop.permute.xlu1 %560 }
 0x161   : > { %6580 = vst [vmem:[#allocation75_spill] sm:$0xff] %v4631_v59 }
 0x162   : > { %v2102_v11 = vrot.slane %v2094_v15, %v4267_v57 }
 0x163   : > { %v4613_v19 = vpop.permute.xlu0 %644 }
 0x164   : > { %6574 = vst [vmem:[#allocation69_spill] sm:$0xff] %v4613_v19  ;;  %v2110_v24 = vcombine.low %v4596_v7, %v4613_v19  ;;  %v4641_v10 = vpop.permute.xlu1 %571 }
 0x165   : > { %6582 = vst [vmem:[#allocation77_spill] sm:$0xff] %v4641_v10 }
 0x166   : > { %v2118_v1 = vrot.slane %v2110_v24, %v4267_v57 }
 0x167   : > { %v4621_v31 = vpop.permute.xlu0 %655 }
 0x168   : > { %6576 = vst [vmem:[#allocation71_spill] sm:$0xff] %v4621_v31  ;;  %v2159_v48 = vcombine.high %v2102_v11, %v2118_v1  ;;  %v2158_v15 = vcombine.low %v2102_v11, %v2118_v1 }
 0x16b   : > { %v4623_v2 = vpop.permute.xlu0 %666 }
 0x16c   : > { %6577 = vst [vmem:[#allocation72_spill] sm:$0xff] %v4623_v2 }
 0x16f   : > { %v4627_v35 = vpop.permute.xlu0 %677 }
 0x170   : > { %6579 = vst [vmem:[#allocation74_spill] sm:$0xff] %v4627_v35  ;;  %v2126_v39 = vcombine.low %v4621_v31, %v4627_v35  ;;  %v4644_v31 = vrot.slane %v2158_v15, %v4306_v29  ;;  %v4650_v35 = vrot.slane %v2159_v48, %v4306_v29  ;;  %v4666_v48 = vpop.permute.xlu1 %582 }
 0x171   : > { %6585 = vst [vmem:[#allocation80_spill] sm:$0xff] %v4666_v48 }
 0x172   : > { %v2134_v16 = vrot.slane %v2126_v39, %v4267_v57  ;;  %6583 = vst [vmem:[#allocation78_spill] sm:$0xff] %v4644_v31 }
 0x173   : > { %v4633_v7 = vpop.permute.xlu0 %688 }
 0x174   : > { %6581 = vst [vmem:[#allocation76_spill] sm:$0xff] %v4633_v7  ;;  %v2142_v24 = vcombine.low %v4623_v2, %v4633_v7  ;;  %v4672_v15 = vpop.permute.xlu1 %593 }
 0x175   : > { %6586 = vst [vmem:[#allocation81_spill] sm:$0xff] %v4672_v15 }
 0x176   : > { %v2150_v19 = vrot.slane %v2142_v24, %v4267_v57 }
 0x177   : > { %v4639_v3 = vpop.permute.xlu0 %699 }
 0x178   : > { %v2190_v47 = vcombine.low %v2134_v16, %v2150_v19  ;;  %v2191_v26 = vcombine.high %v2134_v16, %v2150_v19  ;;  %v4676_v2 = vpop.permute.xlu1 %604 }
 0x179   : > { %6587 = vst [vmem:[#allocation82_spill] sm:$0xff] %v4676_v2 }
 0x17a   : > { %v4647_v59 = vrot.slane %v2190_v47, %v4306_v29  ;;  %v4653_v11 = vrot.slane %v2191_v26, %v4306_v29 }
 0x17b   : > { %v4655_v39 = vpop.permute.xlu0 %710 }
 0x17c   : > { %6584 = vst [vmem:[#allocation79_spill] sm:$0xff] %v4647_v59  ;;  %v2223_v1 = vcombine.high %v4644_v31, %v4647_v59  ;;  %v4686_v59 = vpop.permute.xlu1 %615 }
 0x17d   : > { %6588 = vst [vmem:[#allocation83_spill] sm:$0xff] %v4686_v59 }
 0x17e   : > { %3064 = vrot.lane.b32.xlu1 %v2223_v1, %s4038_s18 }
 0x17f   : > { %v4668_v26 = vpop.permute.xlu0 %721 }
 0x180   : > { %v2502_v1 = vcombine.low %v4639_v3, %v4668_v26  ;;  %v4698_v33 = vpop.permute.xlu1 %626 }
 0x181   : > { %6589 = vst [vmem:[#allocation84_spill] sm:$0xff] %v4698_v33 }
 0x182   : > { %v2510_v2 = vrot.slane %v2502_v1, %v4267_v57 }
 0x183   : > { %v4670_v24 = vpop.permute.xlu0 %732 }
 0x184   : > { %v2518_v19 = vcombine.low %v4655_v39, %v4670_v24  ;;  %v4712_v8 = vpop.permute.xlu1 %637 }
 0x185   : > { %6592 = vst [vmem:[#allocation87_spill] sm:$0xff] %v4712_v8  ;;  %v871_v8 = vcombine.high %v4252_v45, %v4263_v55 }
 0x186   : > { %v2526_v31 = vrot.slane %v2518_v19, %v4267_v57 }
 0x187   : > { %v4674_v10 = vpop.permute.xlu0 %743 }
 0x188   : > { %v2566_v27 = vcombine.low %v2510_v2, %v2526_v31  ;;  %v2567_v21 = vcombine.high %v2510_v2, %v2526_v31 }
 0x18a   : > { %v4703_v53 = vrot.slane %v2566_v27, %v4306_v29  ;;  %v6593_v27 = vcombine.low %v4325_v40, %v4328_v41 }
 0x18b   : > { %v4678_v16 = vpop.permute.xlu0 %754 }
 0x18c   : > { %6590 = vst [vmem:[#allocation85_spill] sm:$0xff] %v4703_v53 }
 0x18f   : > { %v4682_v47 = vpop.permute.xlu0 %765 }
 0x190   : > { %v2534_v48 = vcombine.low %v4674_v10, %v4682_v47 }
 0x192   : > { %v2542_v4 = vrot.slane %v2534_v48, %v4267_v57 }
 0x193   : > { %v4691_v15 = vpop.permute.xlu0 %776 }
 0x194   : > { %v2550_v7 = vcombine.low %v4678_v16, %v4691_v15 }
 0x196   : > { %v2558_v14 = vrot.slane %v2550_v7, %v4267_v57  ;;  %v6595_v7 = vcombine.low %v4457_v46, %v4460_v42 }
 0x197   : > { %v4700_v59 = vpop.permute.xlu0 %787 }
 0x198   : > { %v2598_v19 = vcombine.low %v2542_v4, %v2558_v14  ;;  %v2599_v23 = vcombine.high %v2542_v4, %v2558_v14 }
 0x19a   : > { %v4706_v38 = vrot.slane %v2598_v19, %v4306_v29  ;;  %v4723_v19 = vpop.permute.xlu1 %648 }
 0x19b   : > { %v4708_v1 = vpop.permute.xlu0 %798  ;;  %6594 = vst [vmem:[#allocation88_spill] sm:$0xff] %v4723_v19  ;;  %v2581_v19 = vrot.slane %v2567_v21, %v4306_v29 }
 0x19c   : > { %6591 = vst [vmem:[#allocation86_spill] sm:$0xff] %v4706_v38  ;;  %v2631_v58 = vcombine.high %v4703_v53, %v4706_v38  ;;  %v2613_v38 = vrot.slane %v2599_v23, %v4306_v29  ;;  %v919_v23 = vcombine.high %v4287_v12, %v4299_v25 }
 0x19e   : > { %3066 = vrot.lane.b32.xlu0 %v2631_v58, %s4038_s18  ;;  %v4734_v53 = vpop.permute.xlu1 %659  ;;  %v2632_v14 = vcombine.low %v2581_v19, %v2613_v38 }
 0x19f   : > { %v4717_v48 = vpop.permute.xlu0 %809  ;;  %6596 = vst [vmem:[#allocation89_spill] sm:$0xff] %v4734_v53  ;;  %v903_v53 = vcombine.high %v4282_v5, %v4292_v20  ;;  %v1463_v5 = vcombine.high %v4424_v18, %v4434_v61  ;;  %v1447_v61 = vcombine.high %v4419_v43, %v4429_v36  ;;  %v2007_v36 = vcombine.high %v4564_v17, %v4572_v13 }
 0x1a0   : > { %v2638_v21 = vcombine.low %v4700_v59, %v4717_v48 }
 0x1a2   : > { %3086 = vrot.lane.b32.xlu0 %v6593_v27, %s4039_s27  ;;  %v6597_v27 = vcombine.low %v4589_v37, %v4592_v32  ;;  %v4748_v31 = vpop.permute.xlu1 %670  ;;  %v4780_v55 = vrot.slane %v2638_v21, %v4267_v57 }
 0x1a3   : > { %v4725_v33 = vpop.permute.xlu0 %820  ;;  %6598 = vst [vmem:[#allocation90_spill] sm:$0xff] %v4748_v31 }
 0x1a4   : > { %v2654_v2 = vcombine.low %v4708_v1, %v4725_v33 }
 0x1a6   : > { %3090 = vrot.lane.b32.xlu0 %v6595_v7, %s4039_s27  ;;  %v4791_v18 = vpop.permute.xlu1 %681 }
 0x1a7   : > { %v4731_v58 = vpop.permute.xlu0 %831  ;;  %6600 = vst [vmem:[#allocation91_spill] sm:$0xff] %v4791_v18 }
 0x1aa   : > { %3094 = vrot.lane.b32.xlu0 %v6597_v27, %s4039_s27  ;;  %v887_v27 = vcombine.high %v4250_v44, %v4273_v60  ;;  %v6599_v44 = vcombine.high %v4325_v40, %v4328_v41  ;;  %v4770_v60 = vrot.slane %v919_v23, %v4267_v57  ;;  %v4785_v40 = vrot.slane %v903_v53, %v4267_v57 }
 0x1ab   : > { %v4741_v4 = vpop.permute.xlu0 %842  ;;  %v1431_v41 = vcombine.high %v4381_v22, %v4412_v34  ;;  %v6601_v53 = vcombine.high %v4457_v46, %v4460_v42  ;;  %v1415_v22 = vcombine.high %v4378_v52, %v4405_v56  ;;  %v4819_v46 = vrot.slane %v1447_v61, %v4267_v57 }
 0x1ac   : > { %v4777_v45 = vrot.slane %v887_v27, %v4267_v57  ;;  %v982_v43 = vcombine.low %v4785_v40, %v4770_v60  ;;  %v1975_v42 = vcombine.high %v4525_v62, %v4544_v9  ;;  %v1991_v52 = vcombine.high %v4556_v50, %v4568_v54  ;;  %v4842_v9 = vpop.permute.xlu1 %692 }
 0x1ad   : > { %v6602_v56 = vcombine.high %v4589_v37, %v4592_v32  ;;  %v1959_v50 = vcombine.high %v4508_v49, %v4536_v63  ;;  %6605 = vst [vmem:[#allocation94_spill] sm:$0xff] %v4842_v9  ;;  %v4846_v37 = vrot.slane %v2007_v36, %v4267_v57  ;;  %v2551_v54 = vcombine.high %v4678_v16, %v4691_v15 }
 0x1ae   : > { %3098 = vrot.lane.b32.xlu0 %v2632_v14, %s4039_s27  ;;  %v4761_v14 = vrot.slane %v2654_v2, %v4267_v57  ;;  %v4794_v2 = vrot.slane %v871_v8, %v4267_v57  ;;  %v4809_v8 = vrot.slane %v1463_v5, %v4267_v57  ;;  %v4836_v5 = vrot.slane %v1415_v22, %v4267_v57 }
 0x1af   : > { %v4750_v7 = vpop.permute.xlu0 %853  ;;  %v990_v32 = vrot.slane %v982_v43, %v4306_v29  ;;  %v4858_v49 = vrot.slane %v1991_v52, %v4267_v57  ;;  %v4871_v43 = vrot.slane %v1959_v50, %v4267_v57 }
 0x1b0   : > { %v2670_v12 = vcombine.low %v4731_v58, %v4750_v7  ;;  %v2702_v23 = vcombine.low %v4780_v55, %v4761_v14  ;;  %v950_v34 = vcombine.low %v4794_v2, %v4777_v45  ;;  %v1526_v62 = vcombine.low %v4819_v46, %v4809_v8 }
 0x1b1   : > { %v2070_v22 = vcombine.low %v4858_v49, %v4846_v37 }
 0x1b2   : > { %3118 = vrot.lane.b32.xlu0 %v6599_v44, %s4040_s29  ;;  %v2678_v27 = vrot.slane %v2670_v12, %v4267_v57  ;;  %v4816_v44 = vrot.slane %v1431_v41, %v4267_v57  ;;  %v4830_v13 = vrot.slane %v2702_v23, %v4306_v29  ;;  %v4855_v23 = vrot.slane %v1975_v42, %v4267_v57 }
 0x1b3   : > { %v4774_v20 = vpop.permute.xlu0 %864  ;;  %v958_v63 = vrot.slane %v950_v34, %v4306_v29 }
 0x1b4   : > { %v2686_v25 = vcombine.low %v4741_v4, %v4774_v20  ;;  %6603 = vst [vmem:[#allocation92_spill] sm:$0xff] %v4830_v13  ;;  %v1494_v61 = vcombine.low %v4836_v5, %v4816_v44  ;;  %v2038_v34 = vcombine.low %v4871_v43, %v4855_v23 }
 0x1b5   : > { %v1002_v15 = vcombine.low %v958_v63, %v990_v32 }
 0x1b6   : > { %v2694_v21 = vrot.slane %v2686_v25, %v4267_v57  ;;  %3122 = vrot.lane.b32.xlu0 %v6601_v53, %s4040_s29  ;;  %v2633_v25 = vcombine.high %v2581_v19, %v2613_v38  ;;  %v2519_v53 = vcombine.high %v4655_v39, %v4670_v24  ;;  %v2535_v38 = vcombine.high %v4674_v10, %v4682_v47  ;;  %v4880_v47 = vpop.permute.xlu1 %703 }
 0x1b7   : > { %v1534_v19 = vrot.slane %v1526_v62, %v4306_v29  ;;  %v2503_v39 = vcombine.high %v4639_v3, %v4668_v26  ;;  %v4878_v10 = vrot.slane %v2551_v54, %v4267_v57  ;;  %6606 = vst [vmem:[#allocation95_spill] sm:$0xff] %v4880_v47  ;;  %v1502_v24 = vrot.slane %v1494_v61, %v4306_v29 }
 0x1b8   : > { %v2734_v12 = vcombine.low %v2678_v27, %v2694_v21  ;;  %v4886_v36 = vrot.slane %v2519_v53, %v4267_v57  ;;  %v6607_v3 = vcombine.low %v4390_v0, %v4393_v6  ;;  %v2078_v62 = vrot.slane %v2070_v22, %v4306_v29 }
 0x1b9   : > { %v1546_v26 = vcombine.low %v1502_v24, %v1534_v19  ;;  %v4897_v42 = vrot.slane %v2503_v39, %v4267_v57  ;;  %v2703_v54 = vcombine.high %v4780_v55, %v4761_v14  ;;  %v6610_v14 = vcombine.low %v4650_v35, %v4653_v11 }
 0x1ba   : > { %3126 = vrot.lane.b32.xlu0 %v6602_v56, %s4040_s29  ;;  %v4833_v17 = vrot.slane %v2734_v12, %v4306_v29  ;;  %v4889_v12 = vrot.slane %v2535_v38, %v4267_v57  ;;  %v2735_v56 = vcombine.high %v2678_v27, %v2694_v21  ;;  %v4912_v61 = vpop.permute.xlu1 %714 }
 0x1bb   : > { %v2582_v50 = vcombine.low %v4897_v42, %v4886_v36  ;;  %6609 = vst [vmem:[#allocation96_spill] sm:$0xff] %v4912_v61  ;;  %v2717_v38 = vrot.slane %v2703_v54, %v4306_v29 }
 0x1bc   : > { %6604 = vst [vmem:[#allocation93_spill] sm:$0xff] %v4833_v17  ;;  %v2767_v41 = vcombine.high %v4830_v13, %v4833_v17  ;;  %v2614_v52 = vcombine.low %v4889_v12, %v4878_v10  ;;  %v4918_v53 = vrot.slane %v2735_v56, %v4306_v29 }
 0x1bd   : > { %v2590_v55 = vrot.slane %v2582_v50, %v4306_v29  ;;  %v6615_v50 = vld [vmem:[#allocation24_spill] sm:$0xff] }
 0x1be   : > { %3130 = vrot.lane.b32.xlu0 %v2633_v25, %s4040_s29  ;;  %3068 = vrot.lane.b32.xlu1 %v2767_v41, %s4038_s18  ;;  %v6608_v25 = vcombine.low %v4520_v51, %v4523_v28  ;;  %v2046_v41 = vrot.slane %v2038_v34, %v4306_v29  ;;  %v4915_v21 = vrot.slane %v2614_v52, %v4306_v29  ;;  %v4929_v39 = vpop.permute.xlu1 %725  ;;  %v6612_v34 = vld [vmem:[#allocation28_spill] sm:$0xff]  ;;  %v6614_v52 = vld [vmem:[#allocation26_spill] sm:$0xff]  ;;  %s3835_s18 = sshll.u32 %s4023_s9, 10  ;;  %s4054_s9 = smov [#allocation5]  }
 0x1bf   : > { %v2768_v22 = vcombine.low %v2717_v38, %v4918_v53  ;;  %6611 = vst [vmem:[#allocation97_spill] sm:$0xff] %v4929_v39 }
 0x1c0   : > { %v2090_v27 = vcombine.low %v2046_v41, %v2078_v62 }
 0x1c2   : > { %3150 = vrot.lane.b32.xlu0 %v1002_v15, %s4041_s30  ;;  %3088 = vrot.lane.b32.xlu1 %v6607_v3, %s4039_s27  ;;  %v2634_v15 = vcombine.low %v2590_v55, %v4915_v21  ;;  %v1055_v3 = vcombine.high %v6612_v34, %v4369_v30  ;;  %v6617_v30 = vcombine.high %v4390_v0, %v4393_v6  ;;  %v6621_v34 = vld [vmem:[#allocation49_spill] sm:$0xff]  ;;  %v6623_v0 = vld [vmem:[#allocation46_spill] sm:$0xff] }
 0x1c3   : > { %v6624_v6 = vld [vmem:[#allocation41_spill] sm:$0xff] }
 0x1c4   : > { %v4942_v16 = vrot.slane %v1055_v3, %v4267_v57  ;;  %v1547_v3 = vcombine.high %v1502_v24, %v1534_v19  ;;  %v6628_v24 = vld [vmem:[#allocation44_spill] sm:$0xff] }
 0x1c6   : > { %3154 = vrot.lane.b32.xlu0 %v1546_v26, %s4041_s30  ;;  %3092 = vrot.lane.b32.xlu1 %v6608_v25, %s4039_s27  ;;  %v6613_v26 = vld [vmem:[#allocation29_spill] sm:$0xff]  ;;  %v1003_v25 = vcombine.high %v958_v63, %v990_v32 }
 0x1c7   : > { %v1039_v56 = vcombine.high %v6614_v52, %v6613_v26  ;;  %v6620_v63 = vld [vmem:[#allocation53_spill] sm:$0xff]  ;;  %v4953_v52 = vpop.permute.xlu1 %736 }
 0x1c8   : > { %v1599_v26 = vcombine.high %v6621_v34, %v6620_v63  ;;  %6622 = vst [vmem:[#allocation28_spill] sm:$0xff] %v4953_v52  ;;  %v6630_v34 = vld [vmem:[#allocation76_spill] sm:$0xff] }
 0x1ca   : > { %3158 = vrot.lane.b32.xlu0 %v2090_v27, %s4041_s30  ;;  %3096 = vrot.lane.b32.xlu1 %v6610_v14, %s4039_s27  ;;  %v6616_v27 = vld [vmem:[#allocation19_spill] sm:$0xff]  ;;  %v983_v14 = vcombine.high %v4785_v40, %v4770_v60  ;;  %v951_v60 = vcombine.high %v4794_v2, %v4777_v45  ;;  %v4958_v40 = vrot.slane %v1039_v56, %v4267_v57 }
 0x1cb   : > { %v1023_v54 = vcombine.high %v6616_v27, %v6615_v50  ;;  %v1567_v50 = vcombine.high %v6624_v6, %v6623_v0  ;;  %v6625_v27 = vld [vmem:[#allocation51_spill] sm:$0xff]  ;;  %v6627_v45 = vcombine.high %v4520_v51, %v4523_v28  ;;  %v4983_v63 = vrot.slane %v1599_v26, %v4267_v57  ;;  %v6631_v0 = vld [vmem:[#allocation72_spill] sm:$0xff] }
 0x1cc   : > { %v4975_v2 = vrot.slane %v983_v14, %v4306_v29  ;;  %v6629_v56 = vld [vmem:[#allocation39_spill] sm:$0xff]  ;;  %v2091_v6 = vcombine.high %v2046_v41, %v2078_v62  ;;  %v6637_v41 = vcombine.high %v4650_v35, %v4653_v11  ;;  %v2687_v11 = vcombine.high %v4741_v4, %v4774_v20 }
 0x1cd   : > { %v4993_v28 = vrot.slane %v1567_v50, %v4267_v57  ;;  %v2655_v4 = vcombine.high %v4708_v1, %v4725_v33  ;;  %v2671_v20 = vcombine.high %v4731_v58, %v4750_v7  ;;  %v2639_v7 = vcombine.high %v4700_v59, %v4717_v48 }
 0x1ce   : > { %3162 = vrot.lane.b32.xlu0 %v2634_v15, %s4041_s30  ;;  %3100 = vrot.lane.b32.xlu1 %v2768_v22, %s4039_s27  ;;  %v6618_v15 = vld [vmem:[#allocation23_spill] sm:$0xff]  ;;  %v6619_v22 = vld [vmem:[#allocation17_spill] sm:$0xff] }
 0x1cf   : > { %v1007_v32 = vcombine.high %v6619_v22, %v6618_v15  ;;  %v1118_v22 = vcombine.low %v4958_v40, %v4942_v16  ;;  %v5085_v59 = vrot.slane %v2671_v20, %v4267_v57  ;;  %v6644_v20 = vld [vmem:[#allocation14_spill] sm:$0xff] }
 0x1d1   : > { %v4978_v19 = vrot.slane %v1007_v32, %v4267_v57  ;;  %v6632_v32 = vld [vmem:[#allocation69_spill] sm:$0xff]  ;;  %v5012_v50 = vrot.slane %v1118_v22, %v4306_v29  ;;  %v2635_v22 = vcombine.high %v2590_v55, %v4915_v21 }
 0x1d2   : > { %3182 = vrot.lane.b32.xlu0 %v1003_v25, %s4042_s2  ;;  %3120 = vrot.lane.b32.xlu1 %v6617_v30, %s4040_s29  ;;  %v4961_v25 = vrot.slane %v1023_v54, %v4267_v57  ;;  %v6626_v30 = vld [vmem:[#allocation48_spill] sm:$0xff]  ;;  %v1551_v54 = vcombine.high %v6629_v56, %v6628_v24  ;;  %v6635_v24 = vld [vmem:[#allocation74_spill] sm:$0xff]  ;;  %v6636_v56 = vld [vmem:[#allocation71_spill] sm:$0xff] }
 0x1d3   : > { %v1583_v15 = vcombine.high %v6626_v30, %v6625_v27  ;;  %v4988_v27 = vrot.slane %v951_v60, %v4306_v29  ;;  %v6633_v30 = vld [vmem:[#allocation66_spill] sm:$0xff]  ;;  %v2127_v62 = vcombine.high %v6636_v56, %v6635_v24  ;;  %v2769_v24 = vcombine.high %v2717_v38, %v4918_v53 }
 0x1d4   : > { %v1086_v51 = vcombine.low %v4978_v19, %v4961_v25  ;;  %v2111_v26 = vcombine.high %v6633_v30, %v6632_v32  ;;  %v6639_v32 = vld [vmem:[#allocation62_spill] sm:$0xff] }
 0x1d5   : > { %v4996_v14 = vrot.slane %v1583_v15, %v4267_v57  ;;  %v1004_v60 = vcombine.low %v4988_v27, %v4975_v2  ;;  %v1527_v15 = vcombine.high %v4819_v46, %v4809_v8  ;;  %v1495_v8 = vcombine.high %v4836_v5, %v4816_v44 }
 0x1d6   : > { %3186 = vrot.lane.b32.xlu0 %v1547_v3, %s4042_s2  ;;  %3124 = vrot.lane.b32.xlu1 %v6627_v45, %s4040_s29  ;;  %v2143_v3 = vcombine.high %v6631_v0, %v6630_v34  ;;  %v5000_v45 = vpop.permute.xlu1 %747  ;;  %v5017_v34 = vrot.slane %v1551_v54, %v4267_v57  ;;  %v5035_v54 = vrot.slane %v2111_v26, %v4267_v57 }
 0x1d7   : > { %6634 = vst [vmem:[#allocation29_spill] sm:$0xff] %v5000_v45  ;;  %v1662_v0 = vcombine.low %v4996_v14, %v4983_v63  ;;  %v5038_v56 = vrot.slane %v1086_v51, %v4306_v29  ;;  %v2071_v44 = vcombine.high %v4858_v49, %v4846_v37  ;;  %v5056_v53 = vrot.slane %v1527_v15, %v4306_v29 }
 0x1d8   : > { %v5024_v35 = vrot.slane %v2143_v3, %v4267_v57  ;;  %v1630_v46 = vcombine.low %v5017_v34, %v4993_v28  ;;  %v5041_v3 = vrot.slane %v2127_v62, %v4267_v57  ;;  %v5069_v37 = vrot.slane %v2687_v11, %v4267_v57 }
 0x1d9   : > { %v1138_v21 = vcombine.low %v5038_v56, %v5012_v50  ;;  %v5059_v33 = vrot.slane %v1662_v0, %v4306_v29  ;;  %v2039_v49 = vcombine.high %v4871_v43, %v4855_v23  ;;  %v5074_v55 = vrot.slane %v1495_v8, %v4306_v29  ;;  %v6642_v8 = vld [vmem:[#allocation11_spill] sm:$0xff] }
 0x1da   : > { %3190 = vrot.lane.b32.xlu0 %v2091_v6, %s4042_s2  ;;  %3128 = vrot.lane.b32.xlu1 %v6637_v41, %s4040_s29  ;;  %v6638_v6 = vld [vmem:[#allocation67_spill] sm:$0xff]  ;;  %v5051_v5 = vpop.permute.xlu1 %758  ;;  %v2206_v58 = vcombine.low %v5041_v3, %v5024_v35  ;;  %v5077_v38 = vrot.slane %v1630_v46, %v4306_v29  ;;  %v5082_v26 = vrot.slane %v2655_v4, %v4267_v57  ;;  %v6643_v46 = vld [vmem:[#allocation8_spill] sm:$0xff] }
 0x1db   : > { %v2095_v30 = vcombine.high %v6639_v32, %v6638_v6  ;;  %6640 = vst [vmem:[#allocation26_spill] sm:$0xff] %v5051_v5  ;;  %v1548_v48 = vcombine.low %v5074_v55, %v5056_v53  ;;  %v5094_v43 = vrot.slane %v2071_v44, %v4306_v29  ;;  %v2615_v62 = vcombine.high %v4889_v12, %v4878_v10  ;;  %v6645_v44 = vld [vmem:[#allocation12_spill] sm:$0xff] }
 0x1dc   : > { %v1682_v23 = vcombine.low %v5077_v38, %v5059_v33  ;;  %v5099_v41 = vrot.slane %v2639_v7, %v4267_v57  ;;  %v5104_v15 = vrot.slane %v2206_v58, %v4306_v29  ;;  %v5109_v6 = vrot.slane %v2039_v49, %v4306_v29  ;;  %v6646_v58 = vld [vmem:[#allocation15_spill] sm:$0xff]  ;;  %v6647_v7 = vld [vmem:[#allocation13_spill] sm:$0xff] }
 0x1dd   : > { %v5062_v1 = vrot.slane %v2095_v30, %v4267_v57  ;;  %v2583_v32 = vcombine.high %v4897_v42, %v4886_v36  ;;  %v1158_v4 = vcombine.low %v6643_v46, %v6642_v8  ;;  %v1190_v49 = vcombine.low %v6647_v7, %v6646_v58  ;;  %v6654_v46 = vld [vmem:[#allocation36_spill] sm:$0xff] }
 0x1de   : > { %3194 = vrot.lane.b32.xlu0 %v2635_v22, %s4042_s2  ;;  %3132 = vrot.lane.b32.xlu1 %v2769_v24, %s4040_s29  ;;  %v5106_v0 = vpop.permute.xlu1 %769  ;;  %v2718_v10 = vcombine.low %v5099_v41, %v5082_v26  ;;  %v2092_v30 = vcombine.low %v5109_v6, %v5094_v43  ;;  %v5122_v22 = vrot.slane %v2615_v62, %v4306_v29  ;;  %v6656_v7 = vld [vmem:[#allocation40_spill] sm:$0xff] }
 0x1df   : > { %v2174_v51 = vcombine.low %v5062_v1, %v5035_v54  ;;  %6641 = vst [vmem:[#allocation24_spill] sm:$0xff] %v5106_v0  ;;  %v5130_v36 = vrot.slane %v2583_v32, %v4306_v29  ;;  %v1005_v13 = vcombine.high %v4988_v27, %v4975_v2 }
 0x1e0   : > { %v5133_v42 = vrot.slane %v2718_v10, %v4306_v29  ;;  %v5152_v10 = vrot.slane %v1158_v4, %v4267_v57  ;;  %v6653_v4 = vld [vmem:[#allocation38_spill] sm:$0xff] }
 0x1e1   : > { %v2182_v12 = vrot.slane %v2174_v51, %v4306_v29  ;;  %v1702_v8 = vcombine.low %v6654_v46, %v6653_v4  ;;  %v6667_v46 = vld [vmem:[#allocation80_spill] sm:$0xff] }
 0x1e2   : > { %3214 = vrot.lane.b32.xlu0 %v1004_v60, %s4043_s5  ;;  %3152 = vrot.lane.b32.xlu1 %v1138_v21, %s4041_s30  ;;  %v2750_v60 = vcombine.low %v5085_v59, %v5069_v37  ;;  %v1174_v21 = vcombine.low %v6645_v44, %v6644_v20  ;;  %v5141_v51 = vpop.permute.xlu1 %780  ;;  %v6658_v44 = vld [vmem:[#allocation45_spill] sm:$0xff] }
 0x1e3   : > { %v2226_v11 = vcombine.low %v2182_v12, %v5104_v15  ;;  %6648 = vst [vmem:[#allocation19_spill] sm:$0xff] %v5141_v51 }
 0x1e4   : > { %v5125_v24 = vrot.slane %v2750_v60, %v4306_v29  ;;  %v2636_v60 = vcombine.low %v5130_v36, %v5122_v22 }
 0x1e6   : > { %3218 = vrot.lane.b32.xlu0 %v1548_v48, %s4043_s5  ;;  %3156 = vrot.lane.b32.xlu1 %v1682_v23, %s4041_s30  ;;  %v6649_v48 = vld [vmem:[#allocation10_spill] sm:$0xff]  ;;  %v6650_v23 = vld [vmem:[#allocation9_spill] sm:$0xff]  ;;  %v2770_v32 = vcombine.low %v5133_v42, %v5125_v24 }
 0x1e7   : > { %v1142_v62 = vcombine.low %v6650_v23, %v6649_v48  ;;  %v6651_v23 = vld [vmem:[#allocation37_spill] sm:$0xff] }
 0x1e9   : > { %v5161_v17 = vrot.slane %v1142_v62, %v4267_v57  ;;  %v5175_v62 = vpop.permute.xlu1 %791 }
 0x1ea   : > { %3222 = vrot.lane.b32.xlu0 %v2092_v30, %s4043_s5  ;;  %3160 = vrot.lane.b32.xlu1 %v2226_v11, %s4041_s30  ;;  %v5155_v30 = vrot.slane %v1174_v21, %v4267_v57  ;;  %v5158_v11 = vrot.slane %v1190_v49, %v4267_v57  ;;  %v6655_v21 = vld [vmem:[#allocation47_spill] sm:$0xff]  ;;  %v6657_v49 = vld [vmem:[#allocation50_spill] sm:$0xff]  ;;  %6659 = vst [vmem:[#allocation23_spill] sm:$0xff] %v5175_v62 }
 0x1eb   : > { %v1718_v58 = vcombine.low %v6656_v7, %v6655_v21  ;;  %v1734_v20 = vcombine.low %v6658_v44, %v6657_v49  ;;  %v1206_v2 = vcombine.low %v5161_v17, %v5152_v10  ;;  %v1549_v44 = vcombine.high %v5074_v55, %v5056_v53  ;;  %v6662_v21 = vld [vmem:[#allocation75_spill] sm:$0xff]  ;;  %v6663_v53 = vld [vmem:[#allocation70_spill] sm:$0xff] }
 0x1ec   : > { %v1238_v27 = vcombine.low %v5155_v30, %v5158_v11  ;;  %v5195_v49 = vrot.slane %v1702_v8, %v4267_v57  ;;  %v2246_v55 = vcombine.low %v6663_v53, %v6662_v21 }
 0x1ed   : > { %v5198_v7 = vrot.slane %v1718_v58, %v4267_v57  ;;  %v5213_v4 = vpop.permute.xlu1 %802 }
 0x1ee   : > { %3226 = vrot.lane.b32.xlu0 %v2636_v60, %s4043_s5  ;;  %3164 = vrot.lane.b32.xlu1 %v2770_v32, %s4041_s30  ;;  %v1139_v60 = vcombine.high %v5038_v56, %v5012_v50  ;;  %v6652_v32 = vld [vmem:[#allocation35_spill] sm:$0xff]  ;;  %v1087_v50 = vcombine.high %v4978_v19, %v4961_v25  ;;  %v1119_v56 = vcombine.high %v4958_v40, %v4942_v16  ;;  %v6660_v19 = vld [vmem:[#allocation73_spill] sm:$0xff]  ;;  %v6661_v16 = vld [vmem:[#allocation68_spill] sm:$0xff] }
 0x1ef   : > { %v1686_v48 = vcombine.low %v6652_v32, %v6651_v23  ;;  %v5201_v25 = vrot.slane %v1734_v20, %v4267_v57  ;;  %v2230_v40 = vcombine.low %v6661_v16, %v6660_v19  ;;  %6668 = vst [vmem:[#allocation17_spill] sm:$0xff] %v5213_v4  ;;  %v2093_v20 = vcombine.high %v5109_v6, %v5094_v43 }
 0x1f0   : > { %v2227_v16 = vcombine.high %v2182_v12, %v5104_v15  ;;  %v5219_v19 = vrot.slane %v1206_v2, %v4306_v29  ;;  %v1663_v43 = vcombine.high %v4996_v14, %v4983_v63  ;;  %v5240_v6 = vrot.slane %v2246_v55, %v4267_v57 }
 0x1f1   : > { %v5237_v15 = vrot.slane %v2230_v40, %v4267_v57  ;;  %v2790_v63 = vcombine.low %v4912_v61, %v4953_v52  ;;  %v2806_v14 = vcombine.low %v5000_v45, %v5106_v0  ;;  %v1631_v40 = vcombine.high %v5017_v34, %v4993_v28  ;;  %v5264_v55 = vpop.permute.xlu1 %813  ;;  %v6679_v45 = vld [vmem:[#allocation27_spill] sm:$0xff] }
 0x1f2   : > { %3246 = vrot.lane.b32.xlu0 %v1005_v13, %s4044_s12  ;;  %3184 = vrot.lane.b32.xlu1 %v1139_v60, %s4042_s2  ;;  %v1683_v13 = vcombine.high %v5077_v38, %v5059_v33  ;;  %v5192_v60 = vrot.slane %v1686_v48, %v4267_v57  ;;  %v6664_v33 = vld [vmem:[#allocation81_spill] sm:$0xff]  ;;  %v6666_v48 = vld [vmem:[#allocation82_spill] sm:$0xff]  ;;  %6669 = vst [vmem:[#allocation53_spill] sm:$0xff] %v5264_v55 }
 0x1f3   : > { %v6665_v38 = vld [vmem:[#allocation77_spill] sm:$0xff]  ;;  %v2278_v58 = vcombine.low %v6667_v46, %v6666_v48  ;;  %v5229_v46 = vrot.slane %v1087_v50, %v4306_v29  ;;  %v5232_v48 = vrot.slane %v1119_v56, %v4306_v29  ;;  %v2822_v50 = vcombine.low %v5051_v5, %v5141_v51  ;;  %v6677_v5 = vld [vmem:[#allocation18_spill] sm:$0xff] }
 0x1f4   : > { %v2262_v8 = vcombine.low %v6665_v38, %v6664_v33  ;;  %v1782_v38 = vcombine.low %v5198_v7, %v5201_v25  ;;  %v2637_v56 = vcombine.high %v5130_v36, %v5122_v22  ;;  %v2294_v28 = vcombine.low %v5237_v15, %v5240_v6  ;;  %v6690_v33 = vld [vmem:[#allocation65_spill] sm:$0xff] }
 0x1f5   : > { %v5248_v2 = vrot.slane %v2278_v58, %v4267_v57  ;;  %v1140_v58 = vcombine.low %v5229_v46, %v5232_v48  ;;  %v2207_v36 = vcombine.high %v5041_v3, %v5024_v35  ;;  %v2175_v35 = vcombine.high %v5062_v1, %v5035_v54  ;;  %v5304_v3 = vpop.permute.xlu0 %3054 }
 0x1f6   : > { %3250 = vrot.lane.b32.xlu0 %v1549_v44, %s4044_s12  ;;  %3188 = vrot.lane.b32.xlu1 %v1683_v13, %s4042_s2  ;;  %v5222_v44 = vrot.slane %v1238_v27, %v4306_v29  ;;  %v1750_v13 = vcombine.low %v5192_v60, %v5195_v49  ;;  %v5245_v12 = vrot.slane %v2262_v8, %v4267_v57 }
 0x1f7   : > { %v2774_v27 = vcombine.low %v4880_v47, %v4929_v39  ;;  %6670 = vst [vmem:[#allocation49_spill] sm:$0xff] %v5304_v3  ;;  %v6688_v47 = vld [vmem:[#allocation61_spill] sm:$0xff] }
 0x1f8   : > { %v1270_v8 = vcombine.low %v5219_v19, %v5222_v44  ;;  %v5273_v22 = vrot.slane %v1750_v13, %v4306_v29  ;;  %v2326_v34 = vcombine.low %v5245_v12, %v5248_v2  ;;  %v5291_v13 = vrot.slane %v2790_v63, %v4267_v57 }
 0x1f9   : > { %v5338_v3 = vpop.permute.xlu0 %3058 }
 0x1fa   : > { %3254 = vrot.lane.b32.xlu0 %v2093_v20, %s4044_s12  ;;  %3192 = vrot.lane.b32.xlu1 %v2227_v16, %s4042_s2  ;;  %v2771_v16 = vcombine.high %v5133_v42, %v5125_v24  ;;  %v5276_v24 = vrot.slane %v1782_v38, %v4306_v29  ;;  %v5285_v42 = vrot.slane %v1663_v43, %v4306_v29  ;;  %v5308_v43 = vpop.permute.xlu1 %824 }
 0x1fb   : > { %v5288_v20 = vrot.slane %v2774_v27, %v4267_v57  ;;  %v5294_v38 = vrot.slane %v2806_v14, %v4267_v57  ;;  %6671 = vst [vmem:[#allocation46_spill] sm:$0xff] %v5308_v43  ;;  %v5315_v14 = vrot.slane %v2294_v28, %v4306_v29  ;;  %v5318_v54 = vrot.slane %v2326_v34, %v4306_v29 }
 0x1fc   : > { %v1814_v27 = vcombine.low %v5273_v22, %v5276_v24  ;;  %v5334_v28 = vrot.slane %v2175_v35, %v4306_v29  ;;  %6672 = vst [vmem:[#allocation41_spill] sm:$0xff] %v5338_v3 }
 0x1fd   : > { %v2838_v1 = vcombine.low %v5288_v20, %v5291_v13  ;;  %v2358_v34 = vcombine.low %v5315_v14, %v5318_v54 }
 0x1fe   : > { %3258 = vrot.lane.b32.xlu0 %v2637_v56, %s4044_s12  ;;  %3196 = vrot.lane.b32.xlu1 %v2771_v16, %s4042_s2  ;;  %v5297_v56 = vrot.slane %v2822_v50, %v4267_v57  ;;  %v5300_v16 = vrot.slane %v1631_v40, %v4306_v29  ;;  %v2751_v40 = vcombine.high %v5085_v59, %v5069_v37  ;;  %s6348_s2 = scalar_lea.hbm %s6401_s1, %s3835_s18 }
 0x1ff   : > { %v5343_v59 = vrot.slane %v2838_v1, %v4306_v29  ;;  %v6676_v1 = vld [vmem:[#allocation25_spill] sm:$0xff] }
 0x200   : > { %v1684_v63 = vcombine.low %v5300_v16, %v5285_v42  ;;  %v2870_v50 = vcombine.low %v5294_v38, %v5297_v56  ;;  %v1294_v51 = vcombine.low %v6677_v5, %v6676_v1 }
 0x202   : > { %3278 = vrot.lane.b32.xlu0 %v1270_v8, %s4045_s13  ;;  %3216 = vrot.lane.b32.xlu1 %v1140_v58, %s4043_s5  ;;  %v5327_v8 = vrot.slane %v2207_v36, %v4306_v29  ;;  %v2719_v58 = vcombine.high %v5099_v41, %v5082_v26  ;;  %v5346_v26 = vrot.slane %v2870_v50, %v4306_v29  ;;  %v5351_v36 = vpop.permute.xlu1 %835  ;;  %v6678_v50 = vld [vmem:[#allocation31_spill] sm:$0xff] }
 0x203   : > { %v5349_v41 = vrot.slane %v2751_v40, %v4306_v29  ;;  %6673 = vst [vmem:[#allocation51_spill] sm:$0xff] %v5351_v36  ;;  %v1310_v0 = vcombine.low %v6679_v45, %v6678_v50  ;;  %v5364_v40 = vpop.permute.xlu0 %3062  ;;  %v1271_v45 = vcombine.high %v5219_v19, %v5222_v44  ;;  %v6686_v44 = vld [vmem:[#allocation58_spill] sm:$0xff] }
 0x204   : > { %v2228_v37 = vcombine.low %v5334_v28, %v5327_v8  ;;  %v5356_v35 = vrot.slane %v2719_v58, %v4306_v29  ;;  %6680 = vst [vmem:[#allocation48_spill] sm:$0xff] %v5364_v40  ;;  %v2902_v61 = vcombine.low %v5343_v59, %v5346_v26  ;;  %v6682_v58 = vld [vmem:[#allocation30_spill] sm:$0xff]  ;;  %v5382_v40 = vrot.slane %v1294_v51, %v4267_v57  ;;  %v6689_v51 = vld [vmem:[#allocation59_spill] sm:$0xff] }
 0x205   : > { %v5385_v5 = vrot.slane %v1310_v0, %v4267_v57  ;;  %v1854_v39 = vcombine.low %v6689_v51, %v6688_v47  ;;  %v6691_v0 = vld [vmem:[#allocation60_spill] sm:$0xff]  ;;  %v1815_v51 = vcombine.high %v5273_v22, %v5276_v24  ;;  %v6693_v22 = vld [vmem:[#allocation87_spill] sm:$0xff] }
 0x206   : > { %3282 = vrot.lane.b32.xlu0 %v1814_v27, %s4045_s13  ;;  %3220 = vrot.lane.b32.xlu1 %v1684_v63, %s4043_s5  ;;  %v6674_v27 = vld [vmem:[#allocation22_spill] sm:$0xff]  ;;  %v6675_v63 = vld [vmem:[#allocation16_spill] sm:$0xff]  ;;  %v1870_v53 = vcombine.low %v6691_v0, %v6690_v33  ;;  %v1685_v0 = vcombine.high %v5300_v16, %v5285_v42  ;;  %v6694_v24 = vld [vmem:[#allocation83_spill] sm:$0xff] }
 0x207   : > { %v1278_v3 = vcombine.low %v6675_v63, %v6674_v27  ;;  %v5374_v63 = vpop.permute.xlu1 %846  ;;  %v2366_v42 = vcombine.low %v6694_v24, %v6693_v22  ;;  %v6695_v16 = vld [vmem:[#allocation88_spill] sm:$0xff]  ;;  %v2359_v24 = vcombine.high %v5315_v14, %v5318_v54  ;;  %v6715_v22 = vld [vmem:[#allocation45_spill] sm:$0xff] }
 0x208   : > { %6683 = vst [vmem:[#allocation44_spill] sm:$0xff] %v5374_v63  ;;  %v6696_v33 = vld [vmem:[#allocation84_spill] sm:$0xff] }
 0x209   : > { %v5379_v50 = vrot.slane %v1278_v3, %v4267_v57  ;;  %v6687_v3 = vld [vmem:[#allocation54_spill] sm:$0xff]  ;;  %v2382_v47 = vcombine.low %v6696_v33, %v6695_v16  ;;  %v2229_v33 = vcombine.high %v5334_v28, %v5327_v8  ;;  %v5469_v8 = vrot.slane %v2366_v42, %v4267_v57 }
 0x20a   : > { %3286 = vrot.lane.b32.xlu0 %v2358_v34, %s4045_s13  ;;  %3224 = vrot.lane.b32.xlu1 %v2228_v37, %s4043_s5  ;;  %v2772_v34 = vcombine.low %v5356_v35, %v5349_v41  ;;  %v6681_v37 = vld [vmem:[#allocation34_spill] sm:$0xff]  ;;  %v1838_v27 = vcombine.low %v6687_v3, %v6686_v44 }
 0x20b   : > { %v1326_v52 = vcombine.low %v6682_v58, %v6681_v37  ;;  %v6684_v58 = vld [vmem:[#allocation57_spill] sm:$0xff]  ;;  %v6685_v37 = vld [vmem:[#allocation52_spill] sm:$0xff]  ;;  %v5472_v28 = vrot.slane %v2382_v47, %v4267_v57  ;;  %v2926_v47 = vcombine.low %v5213_v4, %v5308_v43  ;;  %v6714_v16 = vld [vmem:[#allocation50_spill] sm:$0xff] }
 0x20c   : > { %v1822_v19 = vcombine.low %v6685_v37, %v6684_v58  ;;  %v1735_v37 = vcombine.high %v6715_v22, %v6714_v16 }
 0x20e   : > { %3290 = vrot.lane.b32.xlu0 %v2902_v61, %s4045_s13  ;;  %3228 = vrot.lane.b32.xlu1 %v2772_v34, %s4043_s5  ;;  %v1141_v61 = vcombine.high %v5229_v46, %v5232_v48  ;;  %v5392_v34 = vrot.slane %v1326_v52, %v4267_v57  ;;  %v1207_v52 = vcombine.high %v5161_v17, %v5152_v10  ;;  %s3712_s5 = scalar_lea.sflag [#allocation4], %s4178_s26 }
 0x20f   : > { %v1239_v46 = vcombine.high %v5155_v30, %v5158_v11  ;;  %v1342_v48 = vcombine.low %v5379_v50, %v5382_v40  ;;  %v5422_v17 = vrot.slane %v1838_v27, %v4267_v57  ;;  %v5425_v10 = vrot.slane %v1854_v39, %v4267_v57  ;;  %v5427_v30 = vpop.permute.xlu1 %857  ;;  %v6697_v27 = vld [vmem:[#allocation89_spill] sm:$0xff] }
 0x210   : > { %v5387_v1 = vpop.permute.xlu0 %3066  ;;  %6692 = vst [vmem:[#allocation39_spill] sm:$0xff] %v5427_v30  ;;  %v5430_v11 = vrot.slane %v1870_v53, %v4267_v57  ;;  %v2414_v39 = vcombine.low %v4748_v31, %v4842_v9  ;;  %v5443_v44 = vrot.slane %v1207_v52, %v4306_v29  ;;  %v1751_v31 = vcombine.high %v5192_v60, %v5195_v49 }
 0x211   : > { %v1783_v52 = vcombine.high %v5198_v7, %v5201_v25  ;;  %v2910_v60 = vcombine.low %v5175_v62, %v5264_v55  ;;  %v6709_v62 = vld [vmem:[#allocation9_spill] sm:$0xff]  ;;  %v1375_v22 = vcombine.high %v5385_v5, %v5392_v34 }
 0x212   : > { %3310 = vrot.lane.b32.xlu0 %v1271_v45, %s4046_s15  ;;  %3248 = vrot.lane.b32.xlu1 %v1141_v61, %s4044_s12  ;;  %v1374_v45 = vcombine.low %v5385_v5, %v5392_v34  ;;  %v5419_v61 = vrot.slane %v1822_v19, %v4267_v57  ;;  %v2398_v19 = vcombine.low %v6697_v27, %v4791_v18  ;;  %v6713_v27 = vld [vmem:[#allocation40_spill] sm:$0xff] }
 0x213   : > { %v1918_v54 = vcombine.low %v5425_v10, %v5430_v11  ;;  %v5480_v49 = vrot.slane %v2414_v39, %v4267_v57  ;;  %v5484_v25 = vpop.permute.xlu1 %868 }
 0x214   : > { %v5410_v3 = vpop.permute.xlu0 %3086  ;;  %v1886_v9 = vcombine.low %v5419_v61, %v5422_v17  ;;  %v5464_v14 = vrot.slane %v1374_v45, %v4306_v29  ;;  %v5477_v7 = vrot.slane %v2398_v19, %v4267_v57  ;;  %6698 = vst [vmem:[#allocation76_spill] sm:$0xff] %v5484_v25  ;;  %v5508_v19 = vrot.slane %v1783_v52, %v4306_v29 }
 0x215   : > { %v5525_v52 = vrot.slane %v2910_v60, %v4267_v57 }
 0x216   : > { %3314 = vrot.lane.b32.xlu0 %v1815_v51, %s4046_s15  ;;  %3252 = vrot.lane.b32.xlu1 %v1685_v0, %s4044_s12  ;;  %v5452_v51 = vrot.slane %v1239_v46, %v4306_v29  ;;  %v5455_v0 = vrot.slane %v1342_v48, %v4306_v29  ;;  %v2903_v46 = vcombine.high %v5343_v59, %v5346_v26 }
 0x217   : > { %v2958_v48 = vcombine.low %v5374_v63, %v5484_v25  ;;  %v5503_v26 = vrot.slane %v1751_v31, %v4306_v29  ;;  %v5511_v39 = vrot.slane %v1886_v9, %v4306_v29  ;;  %v2327_v31 = vcombine.high %v5245_v12, %v5248_v2  ;;  %v5538_v12 = vpop.permute.xlu1 %3056 }
 0x218   : > { %v5445_v53 = vpop.permute.xlu0 %3090  ;;  %v1272_v42 = vcombine.low %v5443_v44, %v5452_v51  ;;  %v1406_v59 = vcombine.low %v5455_v0, %v5464_v14  ;;  %v5528_v9 = vrot.slane %v2926_v47, %v4267_v57  ;;  %6699 = vst [vmem:[#allocation72_spill] sm:$0xff] %v5538_v12 }
 0x219   : > { %v1816_v2 = vcombine.low %v5503_v26, %v5508_v19  ;;  %v1817_v34 = vcombine.high %v5503_v26, %v5508_v19 }
 0x21a   : > { %3318 = vrot.lane.b32.xlu0 %v2359_v24, %s4046_s15  ;;  %3256 = vrot.lane.b32.xlu1 %v2229_v33, %s4044_s12  ;;  %v2942_v33 = vcombine.low %v5351_v36, %v5427_v30  ;;  %v2773_v24 = vcombine.high %v5356_v35, %v5349_v41  ;;  %v5514_v41 = vrot.slane %v1918_v54, %v4306_v29  ;;  %v6702_v36 = vld [vmem:[#allocation15_spill] sm:$0xff] }
 0x21b   : > { %v2295_v35 = vcombine.high %v5237_v15, %v5240_v6  ;;  %v5534_v15 = vrot.slane %v2958_v48, %v4267_v57  ;;  %v2974_v63 = vcombine.low %v5525_v52, %v5528_v9  ;;  %v5578_v30 = vpop.permute.xlu1 %3060 }
 0x21c   : > { %v5494_v45 = vpop.permute.xlu0 %3094  ;;  %v5531_v54 = vrot.slane %v2942_v33, %v4267_v57  ;;  %v1950_v60 = vcombine.low %v5511_v39, %v5514_v41  ;;  %v5550_v33 = vrot.slane %v2327_v31, %v4306_v29  ;;  %6704 = vst [vmem:[#allocation69_spill] sm:$0xff] %v5578_v30 }
 0x21d   : > { %v5547_v47 = vrot.slane %v2295_v35, %v4306_v29 }
 0x21e   : > { %3322 = vrot.lane.b32.xlu0 %v2903_v46, %s4046_s15  ;;  %3260 = vrot.lane.b32.xlu1 %v2773_v24, %s4044_s12  ;;  %v2430_v46 = vcombine.low %v5469_v8, %v5472_v28  ;;  %v2462_v24 = vcombine.low %v5477_v7, %v5480_v49  ;;  %v3006_v35 = vcombine.low %v5531_v54, %v5534_v15  ;;  %s3949_s12 = scalar_lea.vmem %s6343_s28, 1024 }
 0x21f   : > { %p3950_p8 = scmp.ne.s32.totalorder %s6343_s28, %s3949_s12 }
 0x220   : > { %v5536_v6 = vpop.permute.xlu0 %3098  ;;  %v5553_v48 = vrot.slane %v2430_v46, %v4306_v29  ;;  %v5556_v12 = vrot.slane %v2462_v24, %v4306_v29  ;;  %v6700_v46 = vld [vmem:[#allocation14_spill] sm:$0xff]  ;;  %v6701_v24 = vld [vmem:[#allocation12_spill] sm:$0xff] }
 0x221   : > { %v1175_v25 = vcombine.high %v6701_v24, %v6700_v46  ;;  %v5589_v46 = vrot.slane %v2974_v63, %v4306_v29  ;;  %v6705_v24 = vld [vmem:[#allocation11_spill] sm:$0xff]  ;;  %p3951_p11 = pnand %p3950_p8, %p6799_p9 }
 0x222   : > { %3342 = vrot.lane.b32.xlu0 %v1272_v42, %s4047_s16  ;;  %3280 = vrot.lane.b32.xlu1 %v1406_v59, %s4045_s13  ;;  %v2839_v42 = vcombine.high %v5288_v20, %v5291_v13  ;;  %v2871_v59 = vcombine.high %v5294_v38, %v5297_v56  ;;  %v6703_v20 = vld [vmem:[#allocation13_spill] sm:$0xff]  ;;  %v2360_v38 = vcombine.low %v5547_v47, %v5550_v33 }
 0x223   : > { %v1191_v13 = vcombine.high %v6703_v20, %v6702_v36  ;;  %v2494_v56 = vcombine.low %v5553_v48, %v5556_v12  ;;  %v5592_v36 = vrot.slane %v3006_v35, %v4306_v29  ;;  %v6706_v20 = vld [vmem:[#allocation8_spill] sm:$0xff]  ;;  %v5599_v43 = vrot.slane %v1175_v25, %v4267_v57  ;;  %p3952_p0 = pneg %p3951_p11 }
 0x224   : > { %v5566_v31 = vpop.permute.xlu0 %3118  ;;  %v1159_v30 = vcombine.high %v6706_v20, %v6705_v24  ;;  %v1687_v25 = vcombine.high %v6652_v32, %v6651_v23  ;;  %v6710_v24 = vld [vmem:[#allocation38_spill] sm:$0xff]  ;;  %v6711_v20 = vld [vmem:[#allocation36_spill] sm:$0xff] }
 0x226   : > { %3346 = vrot.lane.b32.xlu0 %v1816_v2, %s4047_s16  ;;  %3284 = vrot.lane.b32.xlu1 %v1950_v60, %s4045_s13  ;;  %v5583_v2 = vrot.slane %v2839_v42, %v4306_v29  ;;  %v5586_v60 = vrot.slane %v2871_v59, %v4306_v29  ;;  %v5602_v42 = vrot.slane %v1191_v13, %v4267_v57  ;;  %v5604_v59 = vpop.permute.xlu1 %3064 }
 0x227   : > { %6707 = vst [vmem:[#allocation66_spill] sm:$0xff] %v5604_v59  ;;  %v1703_v13 = vcombine.high %v6711_v20, %v6710_v24  ;;  %v6712_v59 = vld [vmem:[#allocation47_spill] sm:$0xff]  ;;  %v5625_v58 = vrot.slane %v1159_v30, %v4267_v57  ;;  %v1343_v30 = vcombine.high %v5379_v50, %v5382_v40  ;;  %v5645_v16 = vrot.slane %v1687_v25, %v4267_v57  ;;  %v6720_v24 = vld [vmem:[#allocation81_spill] sm:$0xff] }
 0x228   : > { %v5580_v4 = vpop.permute.xlu0 %3122  ;;  %v2904_v35 = vcombine.low %v5583_v2, %v5586_v60  ;;  %v1719_v18 = vcombine.high %v6713_v27, %v6712_v59  ;;  %v6721_v20 = vld [vmem:[#allocation77_spill] sm:$0xff] }
 0x229   : > { %v5648_v59 = vrot.slane %v1703_v13, %v4267_v57  ;;  %v2263_v13 = vcombine.high %v6721_v20, %v6720_v24  ;;  %v5684_v19 = vrot.slane %v1343_v30, %v4306_v29  ;;  %v2361_v30 = vcombine.high %v5547_v47, %v5550_v33  ;;  %v6725_v33 = vld [vmem:[#allocation97_spill] sm:$0xff]  ;;  %v6729_v20 = vld [vmem:[#allocation24_spill] sm:$0xff] }
 0x22a   : > { %3350 = vrot.lane.b32.xlu0 %v2360_v38, %s4047_s16  ;;  %3288 = vrot.lane.b32.xlu1 %v2494_v56, %s4045_s13  ;;  %v3038_v38 = vcombine.low %v5589_v46, %v5592_v36  ;;  %v6708_v56 = vld [vmem:[#allocation10_spill] sm:$0xff] }
 0x22b   : > { %v1143_v55 = vcombine.high %v6709_v62, %v6708_v56  ;;  %v1254_v62 = vcombine.low %v5599_v43, %v5602_v42  ;;  %v6719_v56 = vld [vmem:[#allocation70_spill] sm:$0xff]  ;;  %v1766_v26 = vcombine.low %v5645_v16, %v5648_v59 }
 0x22c   : > { %v5606_v63 = vpop.permute.xlu0 %3126  ;;  %v2247_v25 = vcombine.high %v6719_v56, %v6662_v21  ;;  %v6728_v56 = vld [vmem:[#allocation96_spill] sm:$0xff] }
 0x22d   : > { %v5638_v27 = vrot.slane %v1143_v55, %v4267_v57  ;;  %v5653_v55 = vrot.slane %v1719_v18, %v4267_v57  ;;  %v6717_v18 = vld [vmem:[#allocation73_spill] sm:$0xff]  ;;  %v5725_v47 = vrot.slane %v1766_v26, %v4306_v29 }
 0x22e   : > { %3354 = vrot.lane.b32.xlu0 %v2904_v35, %s4047_s16  ;;  %3292 = vrot.lane.b32.xlu1 %v3038_v38, %s4045_s13  ;;  %v1273_v35 = vcombine.high %v5443_v44, %v5452_v51  ;;  %v1407_v38 = vcombine.high %v5455_v0, %v5464_v14  ;;  %v5656_v44 = vrot.slane %v1735_v37, %v4267_v57  ;;  %v6718_v14 = vld [vmem:[#allocation68_spill] sm:$0xff]  ;;  %s3953_s13 = sshll.u32 %s4054_s9, 4  ;;  %s3954_s13 = int_to_ptr.vmem [resolvable:$false] %s3953_s13 }
 0x22f   : > { %v1222_v5 = vcombine.low %v5638_v27, %v5625_v58  ;;  %v1951_v51 = vcombine.high %v5511_v39, %v5514_v41  ;;  %v5669_v0 = vrot.slane %v1254_v62, %v4306_v29  ;;  %v2231_v37 = vcombine.high %v6718_v14, %v6717_v18  ;;  %p3956_p6 = scmp.lt.s32.totalorder %s6343_s28, %s3954_s13 }
 0x230   : > { %v5629_v23 = vpop.permute.xlu1 %3068  ;;  %v5631_v32 = vpop.permute.xlu0 %3130  ;;  %v5687_v39 = vrot.slane %v1375_v22, %v4306_v29  ;;  %v1798_v21 = vcombine.low %v5653_v55, %v5656_v44  ;;  %v1887_v41 = vcombine.high %v5419_v61, %v5422_v17  ;;  %v1919_v62 = vcombine.high %v5425_v10, %v5430_v11 }
 0x231   : > { %v2495_v22 = vcombine.high %v5553_v48, %v5556_v12  ;;  %v5707_v14 = vrot.slane %v2231_v37, %v4267_v57  ;;  %v5710_v61 = vrot.slane %v2247_v25, %v4267_v57  ;;  %v5713_v17 = vrot.slane %v2263_v13, %v4267_v57  ;;  %v6726_v48 = vld [vmem:[#allocation95_spill] sm:$0xff]  ;;  %v6727_v37 = vld [vmem:[#allocation28_spill] sm:$0xff]  ;;  %v6730_v13 = vld [vmem:[#allocation29_spill] sm:$0xff] }
 0x232   : > { %3374 = vrot.lane.b32.xlu0 %v1273_v35, %s4048_s17  ;;  %3312 = vrot.lane.b32.xlu1 %v1407_v38, %s4046_s15  ;;  %v6722_v35 = vld [vmem:[#allocation82_spill] sm:$0xff]  ;;  %v6723_v38 = vld [vmem:[#allocation80_spill] sm:$0xff]  ;;  %v1408_v12 = vcombine.low %v5684_v19, %v5687_v39  ;;  %v5732_v25 = vrot.slane %v1798_v21, %v4306_v29  ;;  %v5735_v24 = vrot.slane %v1887_v41, %v4306_v29 }
 0x233   : > { %v3039_v21 = vcombine.high %v5589_v46, %v5592_v36  ;;  %v2310_v41 = vcombine.low %v5707_v14, %v5710_v61 }
 0x234   : > { %v5660_v50 = vpop.permute.xlu1 %3088  ;;  %v5662_v40 = vpop.permute.xlu0 %3150 }
 0x235   : > { %6716 = vst [vmem:[#allocation74_spill] sm:$0xff] %v5660_v50  ;;  %v2279_v50 = vcombine.high %v6723_v38, %v6722_v35  ;;  %v2807_v35 = vcombine.high %v6730_v13, %v6729_v20  ;;  %v6731_v38 = vld [vmem:[#allocation19_spill] sm:$0xff]  ;;  %v2463_v20 = vcombine.high %v5477_v7, %v5480_v49 }
 0x236   : > { %3378 = vrot.lane.b32.xlu0 %v1817_v34, %s4048_s17  ;;  %3316 = vrot.lane.b32.xlu1 %v1951_v51, %s4046_s15  ;;  %v5704_v51 = vrot.slane %v1222_v5, %v4306_v29  ;;  %v2775_v5 = vcombine.high %v6726_v48, %v6725_v33  ;;  %v2905_v33 = vcombine.high %v5583_v2, %v5586_v60  ;;  %v6733_v2 = vld [vmem:[#allocation85_spill] sm:$0xff]  ;;  %v6734_v60 = vld [vmem:[#allocation86_spill] sm:$0xff] }
 0x237   : > { %v5716_v10 = vrot.slane %v2279_v50, %v4267_v57  ;;  %v2791_v50 = vcombine.high %v6728_v56, %v6727_v37  ;;  %v5754_v37 = vrot.slane %v1919_v62, %v4306_v29  ;;  %v2431_v56 = vcombine.high %v5469_v8, %v5472_v28 }
 0x238   : > { %v5695_v18 = vpop.permute.xlu1 %3092  ;;  %v5697_v34 = vpop.permute.xlu0 %3154  ;;  %v1274_v11 = vcombine.low %v5704_v51, %v5669_v0  ;;  %v6735_v46 = vcombine.low %v6733_v2, %v6734_v60  ;;  %v5768_v62 = vrot.slane %v2775_v5, %v4267_v57  ;;  %v5776_v28 = vrot.slane %v2807_v35, %v4267_v57 }
 0x239   : > { %6724 = vst [vmem:[#allocation71_spill] sm:$0xff] %v5695_v18  ;;  %v2342_v48 = vcombine.low %v5713_v17, %v5716_v10  ;;  %v5771_v13 = vrot.slane %v2791_v50, %v4267_v57  ;;  %v6737_v50 = vld [vmem:[#allocation20_spill] sm:$0xff]  ;;  %v1818_v35 = vcombine.low %v5725_v47, %v5732_v25  ;;  %v5802_v2 = vrot.slane %v2310_v41, %v4306_v29 }
 0x23a   : > { %3382 = vrot.lane.b32.xlu0 %v2361_v30, %s4048_s17  ;;  %3320 = vrot.lane.b32.xlu1 %v2495_v22, %s4046_s15  ;;  %v6732_v30 = vld [vmem:[#allocation26_spill] sm:$0xff]  ;;  %v3533_v36 = vsel %vm3526_vm0, %v6735_v46, %v5387_v1  ;;  %v2975_v41 = vcombine.high %v5525_v52, %v5528_v9  ;;  %v6745_v52 = vld [vmem:[#allocation16_spill] sm:$0xff] }
 0x23b   : > { %v2823_v22 = vcombine.high %v6732_v30, %v6731_v38  ;;  %v3542_v8 = vsel %vm3535_vm1, %v3533_v36, %v5536_v6  ;;  %v6736_v38 = vld [vmem:[#allocation49_spill] sm:$0xff]  ;;  %v5805_v60 = vrot.slane %v2342_v48, %v4306_v29  ;;  %v2854_v46 = vcombine.low %v5768_v62, %v5771_v13 }
 0x23c   : > { %v5741_v26 = vpop.permute.xlu1 %3096  ;;  %v5743_v18 = vpop.permute.xlu0 %3158  ;;  %v3551_v7 = vsel %vm3544_vm2, %v3542_v8, %v5631_v32  ;;  %v6738_v30 = vld [vmem:[#allocation21_spill] sm:$0xff]  ;;  %v3007_v48 = vcombine.high %v5531_v54, %v5534_v15  ;;  %v6747_v54 = vld [vmem:[#allocation18_spill] sm:$0xff] }
 0x23d   : > { %v5779_v1 = vrot.slane %v2823_v22, %v4267_v57  ;;  %v1952_v22 = vcombine.low %v5735_v24, %v5754_v37 }
 0x23e   : > { %3386 = vrot.lane.b32.xlu0 %v2905_v33, %s4048_s17  ;;  %3324 = vrot.lane.b32.xlu1 %v3039_v21, %s4046_s15  ;;  %v6739_v33 = vcombine.low %v6737_v50, %v6738_v30  ;;  %s3955_s15 = scalar_lea.vmem %s3954_s13, 2048 }
 0x23f   : > { %p3957_p13 = scmp.lt.s32.totalorder %s3955_s15, %s3949_s12 }
 0x240   : > { %v5783_v49 = vpop.permute.xlu1 %3100  ;;  %v3163_v5 = vpop.permute.xlu0 %3162  ;;  %v3527_v6 = vsel %vm3526_vm0, %v6739_v33, %v6736_v38  ;;  %v6742_v38 = vld [vmem:[#allocation43_spill] sm:$0xff]  ;;  %v6744_v33 = vld [vmem:[#allocation22_spill] sm:$0xff] }
 0x241   : > { %v5791_v21 = vsel %vm3553_vm3, %v3551_v7, %v3163_v5  ;;  %v3536_v32 = vsel %vm3535_vm1, %v3527_v6, %v5410_v3  ;;  %v5812_v3 = vrot.slane %v2431_v56, %v4306_v29  ;;  %v6740_v56 = vld [vmem:[#allocation41_spill] sm:$0xff]  ;;  %v6741_v5 = vld [vmem:[#allocation42_spill] sm:$0xff]  ;;  %v1279_v9 = vcombine.high %v6745_v52, %v6744_v33  ;;  %v6752_v52 = vld [vmem:[#allocation31_spill] sm:$0xff]  ;;  %p3958_p2 = por %p3957_p13, %p3956_p6 }
 0x242   : > { %3406 = vrot.lane.b32.xlu0 %v1274_v11, %s4049_s22  ;;  %3344 = vrot.lane.b32.xlu1 %v1408_v12, %s4047_s16  ;;  %v3545_v36 = vsel %vm3544_vm2, %v3536_v32, %v5566_v31  ;;  %v5815_v11 = vrot.slane %v2463_v20, %v4306_v29  ;;  %v2886_v12 = vcombine.low %v5776_v28, %v5779_v1  ;;  %v6746_v6 = vld [vmem:[#allocation25_spill] sm:$0xff] }
 0x243   : > { %v3554_v8 = vsel %vm3553_vm3, %v3545_v36, %v5662_v40  ;;  %v6743_v20 = vcombine.low %v6741_v5, %v6742_v38  ;;  %v1295_v15 = vcombine.high %v6747_v54, %v6746_v6  ;;  %v2362_v36 = vcombine.low %v5802_v2, %v5805_v60  ;;  %v6748_v38 = vld [vmem:[#allocation48_spill] sm:$0xff]  ;;  %v6753_v6 = vld [vmem:[#allocation27_spill] sm:$0xff]  ;;  %p3959_p5 = pnand %p3958_p2, %p3952_p0 }
 0x244   : > { %v5825_v7 = vpop.permute.xlu1 %3120  ;;  %v3183_v31 = vpop.permute.xlu0 %3182  ;;  %v5863_v5 = vrot.slane %v3007_v48, %v4306_v29  ;;  %v1311_v54 = vcombine.high %v6753_v6, %v6752_v52  ;;  %v5882_v48 = vrot.slane %v1279_v9, %v4267_v57  ;;  %v6757_v52 = vld [vmem:[#allocation52_spill] sm:$0xff] }
 0x245   : > { %v3529_v50 = vsel %vm3526_vm0, %v6743_v20, %v6740_v56  ;;  %v5833_v30 = vsel %vm3562_vm4, %v3554_v8, %v3183_v31  ;;  %v2496_v8 = vcombine.low %v5812_v3, %v5815_v11  ;;  %v5850_v31 = vrot.slane %v2854_v46, %v4306_v29  ;;  %v6749_v20 = vld [vmem:[#allocation63_spill] sm:$0xff] }
 0x246   : > { %v3538_v40 = vsel %vm3535_vm1, %v3529_v50, %v5445_v53  ;;  %3410 = vrot.lane.b32.xlu0 %v1818_v35, %s4049_s22  ;;  %3348 = vrot.lane.b32.xlu1 %v1952_v22, %s4047_s16  ;;  %v5857_v22 = vrot.slane %v2886_v12, %v4306_v29  ;;  %v6750_v50 = vld [vmem:[#allocation64_spill] sm:$0xff]  ;;  %v6754_v12 = vld [vmem:[#allocation34_spill] sm:$0xff] }
 0x247   : > { %v3547_v32 = vsel %vm3544_vm2, %v3538_v40, %v5580_v4  ;;  %v5860_v4 = vrot.slane %v2975_v41, %v4306_v29  ;;  %v6751_v46 = vcombine.low %v6749_v20, %v6750_v50  ;;  %v6755_v40 = vld [vmem:[#allocation30_spill] sm:$0xff] }
 0x248   : > { %v3556_v56 = vsel %vm3553_vm3, %v3547_v32, %v5697_v34  ;;  %v5854_v53 = vpop.permute.xlu1 %3124  ;;  %v3187_v35 = vpop.permute.xlu0 %3186  ;;  %v1327_v32 = vcombine.high %v6755_v40, %v6754_v12  ;;  %v1409_v40 = vcombine.high %v5684_v19, %v5687_v39 }
 0x249   : > { %v3531_v33 = vsel %vm3526_vm0, %v6751_v46, %v6748_v38  ;;  %v5871_v34 = vsel %vm3562_vm4, %v3556_v56, %v3187_v35  ;;  %v5885_v38 = vrot.slane %v1295_v15, %v4267_v57  ;;  %v5901_v15 = vrot.slane %v1311_v54, %v4267_v57 }
 0x24a   : > { %v3540_v41 = vsel %vm3535_vm1, %v3531_v33, %v5494_v45  ;;  %3414 = vrot.lane.b32.xlu0 %v2362_v36, %s4049_s22  ;;  %3352 = vrot.lane.b32.xlu1 %v2496_v8, %s4047_s16  ;;  %v2906_v45 = vcombine.low %v5850_v31, %v5857_v22  ;;  %v3040_v36 = vcombine.low %v5860_v4, %v5863_v5  ;;  %v6756_v33 = vld [vmem:[#allocation57_spill] sm:$0xff] }
 0x24b   : > { %v3549_v56 = vsel %vm3544_vm2, %v3540_v41, %v5606_v63  ;;  %v5904_v63 = vrot.slane %v1327_v32, %v4267_v57  ;;  %v1255_v8 = vcombine.high %v5599_v43, %v5602_v42  ;;  %v1358_v46 = vcombine.low %v5882_v48, %v5885_v38  ;;  %v6758_v41 = vld [vmem:[#allocation58_spill] sm:$0xff]  ;;  %v6761_v43 = vld [vmem:[#allocation59_spill] sm:$0xff] }
 0x24c   : > { %v3558_v35 = vsel %vm3553_vm3, %v3549_v56, %v5743_v18  ;;  %v5891_v20 = vpop.permute.xlu1 %3128  ;;  %v3191_v50 = vpop.permute.xlu0 %3190  ;;  %v1223_v18 = vcombine.high %v5638_v27, %v5625_v58  ;;  %v1823_v6 = vcombine.high %v6757_v52, %v6756_v33  ;;  %v1275_v32 = vcombine.high %v5704_v51, %v5669_v0  ;;  %v6759_v58 = vld [vmem:[#allocation54_spill] sm:$0xff]  ;;  %v6760_v56 = vld [vmem:[#allocation61_spill] sm:$0xff] }
 0x24d   : > { %v5898_v9 = vsel %vm3562_vm4, %v3558_v35, %v3191_v50  ;;  %v1839_v27 = vcombine.high %v6759_v58, %v6758_v41  ;;  %v1855_v42 = vcombine.high %v6761_v43, %v6760_v56  ;;  %v6762_v35 = vld [vmem:[#allocation65_spill] sm:$0xff]  ;;  %v6763_v50 = vld [vmem:[#allocation60_spill] sm:$0xff]  ;;  %v1390_v33 = vcombine.low %v5901_v15, %v5904_v63  ;;  %v6771_v56 = vld [vmem:[#allocation94_spill] sm:$0xff] }
 0x24e   : > { %3418 = vrot.lane.b32.xlu0 %v2906_v45, %s4049_s22  ;;  %3356 = vrot.lane.b32.xlu1 %v3040_v36, %s4047_s16  ;;  %v1871_v45 = vcombine.high %v6763_v50, %v6762_v35  ;;  %v1767_v0 = vcombine.high %v5645_v16, %v5648_v59  ;;  %v5939_v19 = vrot.slane %v1358_v46, %v4306_v29  ;;  %v6765_v46 = vld [vmem:[#allocation87_spill] sm:$0xff]  ;;  %v6770_v58 = vld [vmem:[#allocation89_spill] sm:$0xff]  ;;  %v6772_v43 = vld [vmem:[#allocation90_spill] sm:$0xff] }
 0x24f   : > { %v5942_v39 = vrot.slane %v1223_v18, %v4306_v29  ;;  %v5945_v51 = vrot.slane %v1255_v8, %v4306_v29  ;;  %v5950_v52 = vrot.slane %v1823_v6, %v4267_v57  ;;  %v1953_v16 = vcombine.high %v5735_v24, %v5754_v37  ;;  %v6766_v6 = vld [vmem:[#allocation83_spill] sm:$0xff]  ;;  %v6767_v24 = vld [vmem:[#allocation88_spill] sm:$0xff] }
 0x250   : > { %v5916_v54 = vpop.permute.xlu1 %3132  ;;  %v3195_v12 = vpop.permute.xlu0 %3194  ;;  %v1819_v59 = vcombine.high %v5725_v47, %v5732_v25  ;;  %v5959_v18 = vrot.slane %v1839_v27, %v4267_v57  ;;  %v5962_v8 = vrot.slane %v1855_v42, %v4267_v57  ;;  %v6768_v37 = vld [vmem:[#allocation84_spill] sm:$0xff]  ;;  %v5978_v47 = vrot.slane %v1390_v33, %v4306_v29  ;;  %v6769_v25 = vld [vmem:[#allocation91_spill] sm:$0xff] }
 0x251   : > { %v5930_v36 = vsel %vm3562_vm4, %v5791_v21, %v3195_v12  ;;  %v1799_v21 = vcombine.high %v5653_v55, %v5656_v44  ;;  %v5965_v55 = vrot.slane %v1871_v45, %v4267_v57  ;;  %v2383_v41 = vcombine.high %v6768_v37, %v6767_v24  ;;  %v6775_v37 = vld [vmem:[#allocation46_spill] sm:$0xff] }
 0x252   : > { %3376 = vrot.lane.b32.xlu1 %v1409_v40, %s4048_s17  ;;  %3438 = vrot.lane.b32.xlu0 %v1275_v32, %s4050_s23  ;;  %6764 = vst [vmem:[#allocation67_spill] sm:$0xff] %v5962_v8  ;;  %v2367_v32 = vcombine.high %v6766_v6, %v6765_v46  ;;  %v2399_v27 = vcombine.high %v6770_v58, %v6769_v25  ;;  %v6774_v6 = vld [vmem:[#allocation23_spill] sm:$0xff] }
 0x253   : > { %v2497_v50 = vcombine.high %v5812_v3, %v5815_v11  ;;  %v2363_v45 = vcombine.high %v5802_v2, %v5805_v60  ;;  %v5993_v33 = vrot.slane %v1767_v0, %v4306_v29  ;;  %v6004_v3 = vrot.slane %v1799_v21, %v4306_v29  ;;  %v6773_v21 = vld [vmem:[#allocation53_spill] sm:$0xff]  ;;  %v6777_v58 = vld [vmem:[#allocation39_spill] sm:$0xff] }
 0x254   : > { %v5952_v12 = vpop.permute.xlu1 %3152  ;;  %v3215_v40 = vpop.permute.xlu0 %3214  ;;  %v6007_v2 = vrot.slane %v2367_v32, %v4267_v57  ;;  %v6010_v60 = vrot.slane %v2383_v41, %v4267_v57  ;;  %v1410_v11 = vcombine.low %v5939_v19, %v5978_v47  ;;  %v6017_v0 = vrot.slane %v2399_v27, %v4267_v57  ;;  %v6776_v41 = vld [vmem:[#allocation17_spill] sm:$0xff] }
 0x255   : > { %v5969_v44 = vsel %vm3571_vm5, %v5833_v30, %v3215_v40  ;;  %v2415_v30 = vcombine.high %v6772_v43, %v6771_v56  ;;  %v1276_v40 = vcombine.low %v5942_v39, %v5945_v51  ;;  %v2911_v32 = vcombine.high %v6774_v6, %v6773_v21  ;;  %v6778_v56 = vld [vmem:[#allocation51_spill] sm:$0xff] }
 0x256   : > { %3380 = vrot.lane.b32.xlu1 %v1953_v16, %s4048_s17  ;;  %3442 = vrot.lane.b32.xlu0 %v1819_v59, %s4050_s23  ;;  %v1902_v16 = vcombine.low %v5950_v52, %v5959_v18  ;;  %v1934_v59 = vcombine.low %v5962_v8, %v5965_v55  ;;  %v2907_v24 = vcombine.high %v5850_v31, %v5857_v22 }
 0x257   : > { %v2927_v25 = vcombine.high %v6776_v41, %v6775_v37  ;;  %v2943_v43 = vcombine.high %v6778_v56, %v6777_v58  ;;  %v1820_v6 = vcombine.low %v5993_v33, %v6004_v3  ;;  %v2311_v37 = vcombine.high %v5707_v14, %v5710_v61 }
 0x258   : > { %v5984_v42 = vpop.permute.xlu1 %3156  ;;  %v3219_v35 = vpop.permute.xlu0 %3218  ;;  %v6041_v31 = vrot.slane %v1902_v16, %v4306_v29  ;;  %v6044_v22 = vrot.slane %v1934_v59, %v4306_v29  ;;  %v2343_v41 = vcombine.high %v5713_v17, %v5716_v10  ;;  %v2446_v16 = vcombine.low %v6007_v2, %v6010_v60 }
 0x259   : > { %v6001_v46 = vsel %vm3571_vm5, %v5871_v34, %v3219_v35  ;;  %v6020_v34 = vrot.slane %v2415_v30, %v4267_v57  ;;  %v6779_v35 = vld [vmem:[#allocation76_spill] sm:$0xff]  ;;  %v3041_v30 = vcombine.high %v5860_v4, %v5863_v5  ;;  %v6782_v5 = vld [vmem:[#allocation93_spill] sm:$0xff]  ;;  %v6064_v14 = vrot.slane %v2911_v32, %v4267_v57 }
 0x25a   : > { %3384 = vrot.lane.b32.xlu1 %v2497_v50, %s4048_s17  ;;  %3446 = vrot.lane.b32.xlu0 %v2363_v45, %s4050_s23  ;;  %v6780_v50 = vld [vmem:[#allocation44_spill] sm:$0xff]  ;;  %v6069_v17 = vrot.slane %v2927_v25, %v4267_v57 }
 0x25b   : > { %v2959_v45 = vcombine.high %v6780_v50, %v6779_v35  ;;  %v6781_v4 = vld [vmem:[#allocation92_spill] sm:$0xff]  ;;  %v2478_v59 = vcombine.low %v6017_v0, %v6020_v34  ;;  %v6786_v50 = vld [vmem:[#allocation33_spill] sm:$0xff] }
 0x25c   : > { %v6032_v27 = vpop.permute.xlu1 %3160  ;;  %v3223_v8 = vpop.permute.xlu0 %3222  ;;  %v6784_v35 = vld [vmem:[#allocation72_spill] sm:$0xff] }
 0x25d   : > { %v6038_v21 = vsel %vm3571_vm5, %v5898_v9, %v3223_v8  ;;  %v6783_v9 = vcombine.low %v6781_v4, %v6782_v5  ;;  %v6075_v10 = vrot.slane %v2959_v45, %v4267_v57  ;;  %v6785_v32 = vld [vmem:[#allocation32_spill] sm:$0xff]  ;;  %v6788_v45 = vld [vmem:[#allocation74_spill] sm:$0xff]  ;;  %v6097_v5 = vrot.slane %v2343_v41, %v4306_v29 }
 0x25e   : > { %3388 = vrot.lane.b32.xlu1 %v3041_v30, %s4048_s17  ;;  %3450 = vrot.lane.b32.xlu0 %v2907_v24, %s4050_s23  ;;  %v6787_v30 = vcombine.low %v6785_v32, %v6786_v50 }
 0x25f   : > { %v3534_v8 = vsel %vm3526_vm0, %v6783_v9, %v5629_v23  ;;  %v6072_v23 = vrot.slane %v2943_v43, %v4267_v57  ;;  %v1954_v57 = vcombine.low %v6041_v31, %v6044_v22 }
 0x260   : > { %v3543_v61 = vsel %vm3535_vm1, %v3534_v8, %v5783_v49  ;;  %v3165_v58 = vpop.permute.xlu1 %3164  ;;  %v3227_v56 = vpop.permute.xlu0 %3226  ;;  %v3528_v49 = vsel %vm3526_vm0, %v6787_v30, %v6784_v35  ;;  %v6104_v8 = vrot.slane %v2446_v16, %v4306_v29  ;;  %v6790_v16 = vld [vmem:[#allocation55_spill] sm:$0xff] }
 0x261   : > { %v3552_v24 = vsel %vm3544_vm2, %v3543_v61, %v5916_v54  ;;  %v3578_v43 = vsel %vm3571_vm5, %v5930_v36, %v3227_v56  ;;  %v3537_v4 = vsel %vm3535_vm1, %v3528_v49, %v6788_v45  ;;  %v6094_v54 = vrot.slane %v2311_v37, %v4306_v29  ;;  %v6789_v61 = vld [vmem:[#allocation69_spill] sm:$0xff] }
 0x262   : > { %v3561_v25 = vsel %vm3553_vm3, %v3552_v24, %v3165_v58  ;;  %3408 = vrot.lane.b32.xlu1 %v1410_v11, %s4049_s22  ;;  %3470 = vrot.lane.b32.xlu0 %v1276_v40, %s4051_s24  ;;  %v2855_v36 = vcombine.high %v5768_v62, %v5771_v13  ;;  %v3546_v9 = vsel %vm3544_vm2, %v3537_v4, %v5825_v7  ;;  %v6791_v24 = vld [vmem:[#allocation56_spill] sm:$0xff] }
 0x263   : > { %v6107_v11 = vrot.slane %v2478_v59, %v4306_v29  ;;  %v2887_v40 = vcombine.high %v5776_v28, %v5779_v1  ;;  %v2990_v37 = vcombine.low %v6064_v14, %v6069_v17  ;;  %v3022_v41 = vcombine.low %v6072_v23, %v6075_v10  ;;  %v6793_v1 = vld [vmem:[#allocation71_spill] sm:$0xff] }
 0x264   : > { %v3555_v62 = vsel %vm3553_vm3, %v3546_v9, %v5952_v12  ;;  %v3185_v13 = vpop.permute.xlu1 %3184  ;;  %v3247_v7 = vpop.permute.xlu0 %3246  ;;  %v6792_v58 = vcombine.low %v6790_v16, %v6791_v24  ;;  %v2364_v50 = vcombine.low %v6094_v54, %v6097_v5  ;;  %v2869_v30 = vrot.slane %v2855_v36, %v4306_v29  ;;  %v6795_v9 = vld [vmem:[#allocation78_spill] sm:$0xff] }
 0x265   : > { %v3564_v56 = vsel %vm3562_vm4, %v3555_v62, %v3185_v13  ;;  %v3581_v28 = vsel %vm3580_vm6, %v5969_v44, %v3247_v7  ;;  %v2498_v32 = vcombine.low %v6104_v8, %v6107_v11  ;;  %v2901_v4 = vrot.slane %v2887_v40, %v4306_v29  ;;  %v6796_v62 = vld [vmem:[#allocation79_spill] sm:$0xff] }
 0x266   : > { %v3530_v59 = vsel %vm3526_vm0, %v6792_v58, %v6789_v61  ;;  %3412 = vrot.lane.b32.xlu1 %v1954_v57, %s4049_s22  ;;  %3474 = vrot.lane.b32.xlu0 %v1820_v6, %s4051_s24  ;;  %v2998_v57 = vrot.slane %v2990_v37, %v4306_v29  ;;  %v3030_v6 = vrot.slane %v3022_v41, %v4306_v29 }
 0x267   : > { %v3539_v35 = vsel %vm3535_vm1, %v3530_v59, %v6793_v1  ;;  %v6797_v13 = vcombine.low %v6795_v9, %v6796_v62  ;;  %v2908_v58 = vcombine.low %v2869_v30, %v2901_v4  ;;  %v2991_v62 = vcombine.high %v6064_v14, %v6069_v17 }
 0x268   : > { %v3548_v12 = vsel %vm3544_vm2, %v3539_v35, %v5854_v53  ;;  %v3189_v49 = vpop.permute.xlu1 %3188  ;;  %v3251_v45 = vpop.permute.xlu0 %3250  ;;  %v6794_v53 = vld [vmem:[#allocation66_spill] sm:$0xff]  ;;  %v3042_v24 = vcombine.low %v2998_v57, %v3030_v6 }
 0x269   : > { %v3557_v44 = vsel %vm3553_vm3, %v3548_v12, %v5984_v42  ;;  %v3532_v7 = vsel %vm3526_vm0, %v6797_v13, %v6794_v53  ;;  %v3583_v36 = vsel %vm3580_vm6, %v6001_v46, %v3251_v45  ;;  %v3005_v14 = vrot.slane %v2991_v62, %v4306_v29 }
 0x26a   : > { %v3566_v61 = vsel %vm3562_vm4, %v3557_v44, %v3189_v49  ;;  %v3541_v42 = vsel %vm3535_vm1, %v3532_v7, %v5741_v26  ;;  %3416 = vrot.lane.b32.xlu1 %v2498_v32, %s4049_s22  ;;  %3478 = vrot.lane.b32.xlu0 %v2364_v50, %s4051_s24  ;;  %v1955_v50 = vcombine.high %v6041_v31, %v6044_v22  ;;  %vm3702_vm0 = vcmask 523264  }
 0x26b   : > { %v3550_v40 = vsel %vm3544_vm2, %v3541_v42, %v5891_v20  ;;  %v1411_v20 = vcombine.high %v5939_v19, %v5978_v47  ;;  %v1821_v19 = vcombine.high %v5993_v33, %v6004_v3  ;;  %v1359_v47 = vcombine.high %v5882_v48, %v5885_v38  ;;  %v6798_v38 = vld [vmem:[#allocation67_spill] sm:$0xff] }
 0x26c   : > { %v3559_v37 = vsel %vm3553_vm3, %v3550_v40, %v6032_v27  ;;  %v3193_v41 = vpop.permute.xlu1 %3192  ;;  %v3255_v16 = vpop.permute.xlu0 %3254  ;;  %v1277_v27 = vcombine.high %v5942_v39, %v5945_v51  ;;  %v2499_v31 = vcombine.high %v6104_v8, %v6107_v11  ;;  %v2365_v33 = vcombine.high %v6094_v54, %v6097_v5 }
 0x26d   : > { %v3568_v59 = vsel %vm3562_vm4, %v3559_v37, %v3193_v41  ;;  %v3585_v46 = vsel %vm3580_vm6, %v6038_v21, %v3255_v16  ;;  %v1903_v48 = vcombine.high %v5950_v52, %v5959_v18  ;;  %v3043_v8 = vcombine.high %v2998_v57, %v3030_v6 }
 0x26e   : > { %3420 = vrot.lane.b32.xlu1 %v3042_v24, %s4049_s22  ;;  %3482 = vrot.lane.b32.xlu0 %v2908_v58, %s4051_s24  ;;  %v2909_v11 = vcombine.high %v2869_v30, %v2901_v4  ;;  %v1373_v54 = vrot.slane %v1359_v47, %v4306_v29  ;;  %v2479_v30 = vcombine.high %v6017_v0, %v6020_v34 }
 0x26f   : > { %v1917_v52 = vrot.slane %v1903_v48, %v4306_v29 }
 0x270   : > { %v3197_v26 = vpop.permute.xlu1 %3196  ;;  %v3259_v1 = vpop.permute.xlu0 %3258  ;;  %v2493_v34 = vrot.slane %v2479_v30, %v4306_v29 }
 0x271   : > { %v3570_v35 = vsel %vm3562_vm4, %v3561_v25, %v3197_v26  ;;  %v3587_v12 = vsel %vm3580_vm6, %v3578_v43, %v3259_v1  ;;  %v1391_v25 = vcombine.high %v5901_v15, %v5904_v63  ;;  %v1935_v15 = vcombine.high %v6798_v38, %v5965_v55 }
 0x272   : > { %3440 = vrot.lane.b32.xlu1 %v1411_v20, %s4050_s23  ;;  %3502 = vrot.lane.b32.xlu0 %v1277_v27, %s4052_s25  ;;  %v2447_v55 = vcombine.high %v6007_v2, %v6010_v60  ;;  %v3023_v2 = vcombine.high %v6072_v23, %v6075_v10 }
 0x273   : > { %v1405_v5 = vrot.slane %v1391_v25, %v4306_v29  ;;  %v1949_v18 = vrot.slane %v1935_v15, %v4306_v29 }
 0x274   : > { %v3217_v21 = vpop.permute.xlu1 %3216  ;;  %v3279_v32 = vpop.permute.xlu0 %3278  ;;  %v2461_v0 = vrot.slane %v2447_v55, %v4306_v29  ;;  %v3037_v17 = vrot.slane %v3023_v2, %v4306_v29 }
 0x275   : > { %v3573_v39 = vsel %vm3571_vm5, %v3564_v56, %v3217_v21  ;;  %v3590_v51 = vsel %vm3589_vm7, %v3581_v28, %v3279_v32  ;;  %v1412_v6 = vcombine.low %v1373_v54, %v1405_v5  ;;  %v1956_v9 = vcombine.low %v1917_v52, %v1949_v18 }
 0x276   : > { %3444 = vrot.lane.b32.xlu1 %v1955_v50, %s4050_s23  ;;  %3506 = vrot.lane.b32.xlu0 %v1821_v19, %s4052_s25  ;;  %v2500_v40 = vcombine.low %v2461_v0, %v2493_v34  ;;  %v3044_v16 = vcombine.low %v3005_v14, %v3037_v17  ;;  %v1413_v26 = vcombine.high %v1373_v54, %v1405_v5 }
 0x277   : > { %v2501_v19 = vcombine.high %v2461_v0, %v2493_v34 }
 0x278   : > { %v3221_v43 = vpop.permute.xlu1 %3220  ;;  %v3283_v44 = vpop.permute.xlu0 %3282 }
 0x279   : > { %v3575_v3 = vsel %vm3571_vm5, %v3566_v61, %v3221_v43  ;;  %v3592_v22 = vsel %vm3589_vm7, %v3583_v36, %v3283_v44  ;;  %v3045_v43 = vcombine.high %v3005_v14, %v3037_v17 }
 0x27a   : > { %3448 = vrot.lane.b32.xlu1 %v2499_v31, %s4050_s23  ;;  %3510 = vrot.lane.b32.xlu0 %v2365_v33, %s4052_s25 }
 0x27c   : > { %v3225_v63 = vpop.permute.xlu1 %3224  ;;  %v3287_v56 = vpop.permute.xlu0 %3286 }
 0x27d   : > { %v3577_v28 = vsel %vm3571_vm5, %v3568_v59, %v3225_v63  ;;  %v3594_v49 = vsel %vm3589_vm7, %v3585_v46, %v3287_v56 }
 0x27e   : > { %3452 = vrot.lane.b32.xlu1 %v3043_v8, %s4050_s23  ;;  %3514 = vrot.lane.b32.xlu0 %v2909_v11, %s4052_s25 }
 0x280   : > { %v3229_v45 = vpop.permute.xlu1 %3228  ;;  %v3291_v57 = vpop.permute.xlu0 %3290 }
 0x281   : > { %v3579_v4 = vsel %vm3571_vm5, %v3570_v35, %v3229_v45  ;;  %v3596_v53 = vsel %vm3589_vm7, %v3587_v12, %v3291_v57  ;;  %v1957_v35 = vcombine.high %v1917_v52, %v1949_v18 }
 0x282   : > { %3472 = vrot.lane.b32.xlu1 %v1412_v6, %s4051_s24 }
 0x284   : > { %v3249_v60 = vpop.permute.xlu1 %3248  ;;  %v3311_v13 = vpop.permute.xlu0 %3310 }
 0x285   : > { %v3582_v7 = vsel %vm3580_vm6, %v3573_v39, %v3249_v60  ;;  %v3599_v61 = vsel %vm3598_vm8, %v3590_v51, %v3311_v13 }
 0x286   : > { %3476 = vrot.lane.b32.xlu1 %v1956_v9, %s4051_s24 }
 0x288   : > { %v3253_v36 = vpop.permute.xlu1 %3252  ;;  %v3315_v42 = vpop.permute.xlu0 %3314 }
 0x289   : > { %v3584_v23 = vsel %vm3580_vm6, %v3575_v3, %v3253_v36  ;;  %v3601_v10 = vsel %vm3598_vm8, %v3592_v22, %v3315_v42 }
 0x28a   : > { %3480 = vrot.lane.b32.xlu1 %v2500_v40, %s4051_s24 }
 0x28c   : > { %v3257_v37 = vpop.permute.xlu1 %3256  ;;  %v3319_v41 = vpop.permute.xlu0 %3318 }
 0x28d   : > { %v3586_v24 = vsel %vm3580_vm6, %v3577_v28, %v3257_v37  ;;  %v3603_v58 = vsel %vm3598_vm8, %v3594_v49, %v3319_v41 }
 0x28e   : > { %3484 = vrot.lane.b32.xlu1 %v3044_v16, %s4051_s24 }
 0x290   : > { %v3261_v59 = vpop.permute.xlu1 %3260  ;;  %v3323_v46 = vpop.permute.xlu0 %3322 }
 0x291   : > { %v3588_v29 = vsel %vm3580_vm6, %v3579_v4, %v3261_v59  ;;  %v3605_v1 = vsel %vm3598_vm8, %v3596_v53, %v3323_v46 }
 0x292   : > { %3504 = vrot.lane.b32.xlu1 %v1413_v26, %s4052_s25 }
 0x294   : > { %v3281_v20 = vpop.permute.xlu1 %3280  ;;  %v3343_v27 = vpop.permute.xlu0 %3342 }
 0x295   : > { %v3591_v12 = vsel %vm3589_vm7, %v3582_v7, %v3281_v20  ;;  %v3608_v21 = vsel %vm3607_vm9, %v3599_v61, %v3343_v27 }
 0x296   : > { %3508 = vrot.lane.b32.xlu1 %v1957_v35, %s4052_s25 }
 0x298   : > { %v3285_v32 = vpop.permute.xlu1 %3284  ;;  %v3347_v50 = vpop.permute.xlu0 %3346 }
 0x299   : > { %v3593_v39 = vsel %vm3589_vm7, %v3584_v23, %v3285_v32  ;;  %v6234_v51 = vsel %vm3607_vm9, %v3601_v10, %v3347_v50 }
 0x29a   : > { %3512 = vrot.lane.b32.xlu1 %v2501_v19, %s4052_s25 }
 0x29c   : > { %v3289_v47 = vpop.permute.xlu1 %3288  ;;  %v3351_v25 = vpop.permute.xlu0 %3350 }
 0x29d   : > { %v3595_v44 = vsel %vm3589_vm7, %v3586_v24, %v3289_v47  ;;  %v6239_v31 = vsel %vm3607_vm9, %v3603_v58, %v3351_v25 }
 0x29e   : > { %3516 = vrot.lane.b32.xlu1 %v3045_v43, %s4052_s25 }
 0x2a0   : > { %v3293_v33 = vpop.permute.xlu1 %3292  ;;  %v3355_v3 = vpop.permute.xlu0 %3354 }
 0x2a1   : > { %v3597_v22 = vsel %vm3589_vm7, %v3588_v29, %v3293_v33  ;;  %v6244_v48 = vsel %vm3607_vm9, %v3605_v1, %v3355_v3 }
 0x2a4   : > { %v3313_v38 = vpop.permute.xlu1 %3312  ;;  %v3375_v15 = vpop.permute.xlu0 %3374 }
 0x2a5   : > { %v3600_v63 = vsel %vm3598_vm8, %v3591_v12, %v3313_v38  ;;  %v3617_v59 = vsel %vm3616_vm10, %v3608_v21, %v3375_v15 }
 0x2a8   : > { %v3317_v56 = vpop.permute.xlu1 %3316  ;;  %v3379_v8 = vpop.permute.xlu0 %3378 }
 0x2a9   : > { %v3602_v11 = vsel %vm3598_vm8, %v3593_v39, %v3317_v56  ;;  %v3619_v27 = vsel %vm3616_vm10, %v6234_v51, %v3379_v8 }
 0x2ac   : > { %v3321_v54 = vpop.permute.xlu1 %3320  ;;  %v3383_v5 = vpop.permute.xlu0 %3382 }
 0x2ad   : > { %v3604_v28 = vsel %vm3598_vm8, %v3595_v44, %v3321_v54  ;;  %v3621_v39 = vsel %vm3616_vm10, %v6239_v31, %v3383_v5 }
 0x2b0   : > { %v3325_v49 = vpop.permute.xlu1 %3324  ;;  %v3387_v52 = vpop.permute.xlu0 %3386 }
 0x2b1   : > { %v3606_v18 = vsel %vm3598_vm8, %v3597_v22, %v3325_v49  ;;  %v3623_v3 = vsel %vm3616_vm10, %v6244_v48, %v3387_v52 }
 0x2b4   : > { %v3345_v55 = vpop.permute.xlu1 %3344  ;;  %v3407_v30 = vpop.permute.xlu0 %3406 }
 0x2b5   : > { %v6251_v45 = vsel %vm3607_vm9, %v3600_v63, %v3345_v55  ;;  %v3626_v46 = vsel %vm3625_vm11, %v3617_v59, %v3407_v30 }
 0x2b8   : > { %v3349_v57 = vpop.permute.xlu1 %3348  ;;  %v3411_v6 = vpop.permute.xlu0 %3410 }
 0x2b9   : > { %v6254_v4 = vsel %vm3607_vm9, %v3602_v11, %v3349_v57  ;;  %v3628_v12 = vsel %vm3625_vm11, %v3619_v27, %v3411_v6 }
 0x2bc   : > { %v3353_v53 = vpop.permute.xlu1 %3352  ;;  %v3415_v9 = vpop.permute.xlu0 %3414 }
 0x2bd   : > { %v6257_v62 = vsel %vm3607_vm9, %v3604_v28, %v3353_v53  ;;  %v3630_v51 = vsel %vm3625_vm11, %v3621_v39, %v3415_v9 }
 0x2c0   : > { %v3357_v2 = vpop.permute.xlu1 %3356  ;;  %v3419_v60 = vpop.permute.xlu0 %3418 }
 0x2c1   : > { %v6260_v13 = vsel %vm3607_vm9, %v3606_v18, %v3357_v2  ;;  %v3632_v38 = vsel %vm3625_vm11, %v3623_v3, %v3419_v60 }
 0x2c4   : > { %v3377_v0 = vpop.permute.xlu1 %3376  ;;  %v3439_v34 = vpop.permute.xlu0 %3438 }
 0x2c5   : > { %v3635_v26 = vsel %vm3634_vm12, %v3626_v46, %v3439_v34  ;;  %v3618_v28 = vsel %vm3616_vm10, %v6251_v45, %v3377_v0 }
 0x2c8   : > { %v3381_v7 = vpop.permute.xlu1 %3380  ;;  %v3443_v61 = vpop.permute.xlu0 %3442 }
 0x2c9   : > { %v3637_v21 = vsel %vm3634_vm12, %v3628_v12, %v3443_v61  ;;  %v3620_v30 = vsel %vm3616_vm10, %v6254_v4, %v3381_v7 }
 0x2cc   : > { %v6262_v36 = vpop.permute.xlu1 %3384  ;;  %v3447_v42 = vpop.permute.xlu0 %3446 }
 0x2cd   : > { %v3639_v25 = vsel %vm3634_vm12, %v3630_v51, %v3447_v42  ;;  %v3622_v2 = vsel %vm3616_vm10, %v6257_v62, %v6262_v36 }
 0x2d0   : > { %v6264_v40 = vpop.permute.xlu1 %3388  ;;  %v3451_v14 = vpop.permute.xlu0 %3450 }
 0x2d1   : > { %v3641_v31 = vsel %vm3634_vm12, %v3632_v38, %v3451_v14  ;;  %v3624_v61 = vsel %vm3616_vm10, %v6260_v13, %v6264_v40 }
 0x2d4   : > { %v3409_v17 = vpop.permute.xlu1 %3408  ;;  %v3471_v23 = vpop.permute.xlu0 %3470 }
 0x2d5   : > { %v3644_v29 = vsel %vm3643_vm13, %v3635_v26, %v3471_v23  ;;  %v3627_v49 = vsel %vm3625_vm11, %v3618_v28, %v3409_v17 }
 0x2d8   : > { %v3413_v10 = vpop.permute.xlu1 %3412  ;;  %v3475_v37 = vpop.permute.xlu0 %3474 }
 0x2d9   : > { %v3646_v32 = vsel %vm3643_vm13, %v3637_v21, %v3475_v37  ;;  %v3629_v6 = vsel %vm3625_vm11, %v3620_v30, %v3413_v10 }
 0x2dc   : > { %v3417_v41 = vpop.permute.xlu1 %3416  ;;  %v3479_v16 = vpop.permute.xlu0 %3478 }
 0x2dd   : > { %v3648_v43 = vsel %vm3643_vm13, %v3639_v25, %v3479_v16  ;;  %v3631_v0 = vsel %vm3625_vm11, %v3622_v2, %v3417_v41 }
 0x2e0   : > { %v6266_v24 = vpop.permute.xlu1 %3420  ;;  %v3483_v58 = vpop.permute.xlu0 %3482 }
 0x2e1   : > { %v3650_v15 = vsel %vm3643_vm13, %v3641_v31, %v3483_v58  ;;  %v3633_v62 = vsel %vm3625_vm11, %v3624_v61, %v6266_v24 }
 0x2e4   : > { %v3441_v1 = vpop.permute.xlu1 %3440  ;;  %v3503_v20 = vpop.permute.xlu0 %3502 }
 0x2e5   : > { %v3653_v35 = vsel %vm3652_vm14, %v3644_v29, %v3503_v20  ;;  %v3636_v52 = vsel %vm3634_vm12, %v3627_v49, %v3441_v1 }
 0x2e6   : > { %3669 = vrot.lane.b32.xlu0 %v3653_v35, %s4053_s3 }
 0x2e8   : > { %v3445_v50 = vpop.permute.xlu1 %3444  ;;  %v3507_v19 = vpop.permute.xlu0 %3506 }
 0x2e9   : > { %v3655_v47 = vsel %vm3652_vm14, %v3646_v32, %v3507_v19  ;;  %v3638_v53 = vsel %vm3634_vm12, %v3629_v6, %v3445_v50 }
 0x2ea   : > { %3673 = vrot.lane.b32.xlu0 %v3655_v47, %s4053_s3 }
 0x2ec   : > { %v3449_v44 = vpop.permute.xlu1 %3448  ;;  %v3511_v33 = vpop.permute.xlu0 %3510 }
 0x2ed   : > { %v3657_v22 = vsel %vm3652_vm14, %v3648_v43, %v3511_v33  ;;  %v3640_v4 = vsel %vm3634_vm12, %v3631_v0, %v3449_v44 }
 0x2ee   : > { %3677 = vrot.lane.b32.xlu0 %v3657_v22, %s4053_s3 }
 0x2f0   : > { %v3453_v63 = vpop.permute.xlu1 %3452  ;;  %v3515_v56 = vpop.permute.xlu0 %3514 }
 0x2f1   : > { %v3659_v8 = vsel %vm3652_vm14, %v3650_v15, %v3515_v56  ;;  %v3642_v36 = vsel %vm3634_vm12, %v3633_v62, %v3453_v63 }
 0x2f2   : > { %3681 = vrot.lane.b32.xlu0 %v3659_v8, %s4053_s3 }
 0x2f4   : > { %v3473_v11 = vpop.permute.xlu1 %3472 }
 0x2f5   : > { %v3645_v18 = vsel %vm3643_vm13, %v3636_v52, %v3473_v11 }
 0x2f8   : > { %v3477_v54 = vpop.permute.xlu1 %3476 }
 0x2f9   : > { %v3647_v45 = vsel %vm3643_vm13, %v3638_v53, %v3477_v54 }
 0x2fc   : > { %v3481_v5 = vpop.permute.xlu1 %3480 }
 0x2fd   : > { %v3649_v34 = vsel %vm3643_vm13, %v3640_v4, %v3481_v5 }
 0x300   : > { %v3485_v48 = vpop.permute.xlu1 %3484 }
 0x301   : > { %v3651_v14 = vsel %vm3643_vm13, %v3642_v36, %v3485_v48 }
 0x304   : > { %v3505_v55 = vpop.permute.xlu1 %3504 }
 0x305   : > { %v3654_v57 = vsel %vm3652_vm14, %v3645_v18, %v3505_v55 }
 0x306   : > { %3671 = vrot.lane.b32.xlu1 %v3654_v57, %s4053_s3 }
 0x308   : > { %v3509_v9 = vpop.permute.xlu1 %3508 }
 0x309   : > { %v3656_v60 = vsel %vm3652_vm14, %v3647_v45, %v3509_v9 }
 0x30a   : > { %3675 = vrot.lane.b32.xlu1 %v3656_v60, %s4053_s3 }
 0x30c   : > { %v3513_v7 = vpop.permute.xlu1 %3512 }
 0x30d   : > { %v3658_v42 = vsel %vm3652_vm14, %v3649_v34, %v3513_v7 }
 0x30e   : > { %3679 = vrot.lane.b32.xlu1 %v3658_v42, %s4053_s3 }
 0x310   : > { %v3517_v17 = vpop.permute.xlu1 %3516 }
 0x311   : > { %v3660_v23 = vsel %vm3652_vm14, %v3651_v14, %v3517_v17 }
 0x312   : > { %3683 = vrot.lane.b32.xlu1 %v3660_v23, %s4053_s3 }
 0x358   : > { %v3670_v10 = vpop.permute.xlu0 %3669 }
 0x359   : > { %v3694_v13 = vsel %vm3693_vm15, %v3653_v35, %v3670_v10 }
 0x35a   : > { %3703 = vst.msk [vmem:[%s153_s4] sm:$0xff] %vm3702_vm0, %v3694_v13 }
 0x35c   : > { %v3674_v40 = vpop.permute.xlu0 %3673 }
 0x35d   : > { %v3696_v37 = vsel %vm3693_vm15, %v3655_v47, %v3674_v40 }
 0x35e   : > { %3705 = vst.msk [vmem:[%s153_s4 + $0x10] sm:$0xff] %vm3702_vm0, %v3696_v37 }
 0x360   : > { %v3678_v41 = vpop.permute.xlu0 %3677 }
 0x361   : > { %v3698_v16 = vsel %vm3693_vm15, %v3657_v22, %v3678_v41 }
 0x362   : > { %3707 = vst.msk [vmem:[%s153_s4 + $0x20] sm:$0xff] %vm3702_vm0, %v3698_v16 }
 0x364   : > { %v3682_v24 = vpop.permute.xlu0 %3681 }
 0x365   : > { %v3700_v58 = vsel %vm3693_vm15, %v3659_v8, %v3682_v24 }
 0x366   : > { %3709 = vst.msk [vmem:[%s153_s4 + $0x30] sm:$0xff] %vm3702_vm0, %v3700_v58 }
 0x378   : > { %v3672_v59 = vpop.permute.xlu1 %3671 }
 0x379   : > { %v3695_v46 = vsel %vm3693_vm15, %v3654_v57, %v3672_v59 }
 0x37a   : > { %3704 = vst.msk [vmem:[%s153_s4 + $0x8] sm:$0xff] %vm3702_vm0, %v3695_v46 }
 0x37c   : > { %v3676_v26 = vpop.permute.xlu1 %3675 }
 0x37d   : > { %v3697_v29 = vsel %vm3693_vm15, %v3656_v60, %v3676_v26 }
 0x37e   : > { %3706 = vst.msk [vmem:[%s153_s4 + $0x18] sm:$0xff] %vm3702_vm0, %v3697_v29 }
 0x380   : > { %v3680_v1 = vpop.permute.xlu1 %3679 }
 0x381   : > { %v3699_v20 = vsel %vm3693_vm15, %v3658_v42, %v3680_v1 }
 0x382   : > { %3708 = vst.msk [vmem:[%s153_s4 + $0x28] sm:$0xff] %vm3702_vm0, %v3699_v20 }
 0x384   : > { %v3684_v27 = vpop.permute.xlu1 %3683 }
 0x385   : > { %v3701_v35 = vsel %vm3693_vm15, %v3660_v23, %v3684_v27 }
 0x386   : > { %3710 = vst.msk [vmem:[%s153_s4 + $0x38] sm:$0xff] %vm3702_vm0, %v3701_v35 }
 0x387   : > { %3962 = shalt.err (!%p3959_p5)
}
 0x388   : > { %s3963_s16 = scalar_lea.hbm %s6348_s2, 1024  ;;  %s3967_s23 = scalar_lea.hbm %s6401_s1, 2048 }
 0x389   : > { %p3964_p4 = scmp.ne.s32.totalorder %s6348_s2, %s3963_s16  ;;  %p3968_p12 = scmp.lt.u32.totalorder %s6348_s2, %s6401_s1 }
 0x38a   : > { %p3969_p1 = scmp.lt.u32.totalorder %s3967_s23, %s3963_s16  ;;  %p3971_p8 = scmp.lt.u32.totalorder %s3963_s16, %s6348_s2 }
 0x38b   : > { %p3965_p7 = pnand %p3964_p4, %p6799_p9 }
 0x38c   : > { %p3970_p3 = por %p3969_p1, %p3968_p12 }
 0x38d   : > { %p3966_p10 = pneg %p3965_p7 }
 0x38e   : > { %p3972_p11 = por %p3971_p8, %p3970_p3 }
 0x390   : > { %p3973_p0 = pnand %p3972_p11, %p3966_p10 }
 0x392   : > { %3976 = shalt.err (!%p3973_p0)
}
 0x393   : > { %s4055_s3 = smov 128  }
 0x394   : > { %3838 = dma.vmem_to_hbm [thread:$0]  (%p6799_p9), %s6343_s28, 1024, %s6348_s2, %s3712_s5, %s4055_s3, %s4055_s3, %s4041_s30  }
 0x395 PF: > { %s3743_s4 = sand.u32 1, %s4011_s6   ;;  %p6800_p6 = scmp.ne.s32.totalorder %s6510_s21, 0 }
 0x396   : > { %p6801_p13 = scmp.ge.s32.totalorder %s4031_s11, 2  ;;  %s3744_s18 = scalar_lea.sflag [#allocation4], %s3743_s4 }
 0x398   : > { %p3845_p2 = pnand %p6801_p13, %p6800_p6 }
 0x39a   : > { %4006 = dma.done.wait (!%p3845_p2), %s3744_s18, 1024  }
 0x39b   : > { %4008 = vsyncadd (!%p3845_p2), %s3744_s18, 4294966272  ;;  %s17_s11 = sadd.s32 1, %s4031_s11   ;;  %s6802_s6 = smov %s4015_s7 }
 0x39c   : > { %p14_p5 = scmp.ge.s32.totalorder %s17_s11, 4   ;;  %s6803_s7 = smov %s4019_s8 }
 0x39d   : > { %s6804_s8 = smov %s4122_s20  ;;  %s6805_s9 = smov %s4027_s10 }
 0x39e   : > { %s6806_s10 = smov %s6808_s14  ;;  %16 = sbr.rel (!%p14_p5) target bundleno = 6 (0x6), region = 69 }
 0x3a5   :  { %3749 = vsyncpa [#allocation3], 1 }
 0x3a6   :  { %3751 = vsyncpa [#allocation3 + $0x1], 1 }
 0x3a7   :  { %3752 = vsyncpa [#allocation4], 1 }
 0x3a8   :  { %3754 = vsyncpa [#allocation4 + $0x1], 1 }

</bundles_post_ra>
